<compile_context>
chip_gen: v7x
topology: tpu7x:2x2x1
jax: 0.10.0
libtpu: 0.0.40
codegen_flags: <defaults>
</compile_context>

<pallas_src>
import jax
import jax.numpy as jnp
from jax.experimental import pallas as pl
from jax.experimental.pallas import tpu as pltpu

OUT_LANES = 128  # lane-dense fused (logits | value | zero-pad) output width


def _round_up(x, m):
    return (x + m - 1) // m * m


# ----------------------------------------------------------------------------
# Pallas kernel: whole forward pass in one invocation (grid = ()).
# ----------------------------------------------------------------------------
def _mappo_kernel(
    s_ref,       # (T*Np, Sp)      time-major flattened, batch/feature padded obs
    h0_ref,      # (Np, H)         initial hidden state (batch padded)
    c0_ref,      # (Np, H)         initial cell state
    w1_ref,      # (Sp, H)         net1 weight (in x out, K padded with zero rows)
    b1_ref,      # (1, H)
    wih_ref,     # (H, 4H)         lstm weight_ih^T
    whh_ref,     # (H, 4H)         lstm weight_hh^T
    blstm_ref,   # (1, 4H)         bias_ih + bias_hh
    wh1_ref,     # (H, Hp+Hv)      fused head layer-1 weight [Wp1 | Wv1]
    bh1_ref,     # (1, Hp+Hv)
    wh2_ref,     # (Hp+Hv, 128)    block-diag fused head layer-2 weight, lane-padded
    bh2_ref,     # (1, 128)
    out_ref,     # out: (T*Np, 128)  columns [0:A)=logits, [A]=value, rest 0
    state_ref,   # out: (2*Np, H)    rows [0:Np)=hn, [Np:2Np)=cn
):
    f32 = jnp.float32
    TNp = s_ref.shape[0]
    Np, H = h0_ref.shape
    T = TNp // Np
    G = 4 * H

    # ---- hoisted, batched over all T*Np rows: net1 + input-gate contribution ----
    x = jnp.dot(s_ref[...], w1_ref[...], preferred_element_type=f32) + b1_ref[...]
    x = jnp.maximum(x, 0.0)                                              # (T*Np, H)
    xg = jnp.dot(x, wih_ref[...], preferred_element_type=f32) + blstm_ref[...]  # (T*Np, 4H)

    whh = whh_ref[...]

    # Full-width gate activation: 4H == 128 lanes, so one tanh covers all gates.
    # sigmoid(z) = 0.5*(tanh(0.5 z)+1) on i/f/o lanes; tanh(z) on g lanes.
    lane = jax.lax.broadcasted_iota(jnp.int32, (Np, G), 1)
    is_g = (lane >= 2 * H) & (lane < 3 * H)
    scale = jnp.where(is_g, 1.0, 0.5).astype(f32)

    h = h0_ref[...].astype(f32)
    c = c0_ref[...].astype(f32)
    hs = []
    # T is small & static -> straight-line code with static, sublane-aligned slices.
    for t in range(T):
        gates = xg[t * Np:(t + 1) * Np, :] + jnp.dot(h, whh, preferred_element_type=f32)
        tg = jnp.tanh(gates * scale)                 # single full-width EUP push
        act = jnp.where(is_g, tg, 0.5 * tg + 0.5)    # i/f/o -> sigmoid, g -> tanh
        i_g = act[:, 0 * H:1 * H]
        f_g = act[:, 1 * H:2 * H]
        g_g = act[:, 2 * H:3 * H]
        o_g = act[:, 3 * H:4 * H]
        c = f_g * c + i_g * g_g
        h = o_g * jnp.tanh(c)
        hs.append(h)
    # TODO(synk): for large T switch to lax.fori_loop(unroll=True) with xg and hs
    #             resident in VMEM scratch to bound vreg live ranges.

    # single fused state writeback: [hn ; cn]
    state_ref[...] = jnp.concatenate([h, c], axis=0).astype(state_ref.dtype)

    # ---- fused policy/value heads, batched over T*Np rows, lane-dense output ----
    hs_all = jnp.concatenate(hs, axis=0)                                 # (T*Np, H)
    head = jnp.dot(hs_all, wh1_ref[...], preferred_element_type=f32) + bh1_ref[...]
    head = jnp.maximum(head, 0.0)                                        # (T*Np, Hp+Hv)
    out = jnp.dot(head, wh2_ref[...], preferred_element_type=f32) + bh2_ref[...]
    out_ref[...] = out.astype(out_ref.dtype)                             # (T*Np, 128)


def _fuse_head_params(params):
    """Concatenate pi/v layer-1 weights; block-diagonal, lane-padded layer-2."""
    hp = params["wp1"].shape[1]
    hv = params["wv1"].shape[1]
    a = params["wp2"].shape[1]
    wh1 = jnp.concatenate([params["wp1"], params["wv1"]], axis=1)          # (H, Hp+Hv)
    bh1 = jnp.concatenate([params["bp1"], params["bv1"]], axis=1)          # (1, Hp+Hv)
    wh2 = jnp.zeros((hp + hv, OUT_LANES), jnp.float32)
    wh2 = wh2.at[:hp, :a].set(params["wp2"])
    wh2 = wh2.at[hp:, a:a + 1].set(params["wv2"])                          # block-diag
    bh2 = jnp.zeros((1, OUT_LANES), jnp.float32)
    bh2 = bh2.at[:, :a].set(params["bp2"])
    bh2 = bh2.at[:, a:a + 1].set(params["bv2"])
    return wh1, bh1, wh2, bh2, a


def mappo_forward_core(s_flat, h0, c0, params):
    """s_flat: (T*Np, Sp) time-major, padded; h0/c0: (Np, H).
    Returns (out (T*Np, 128) fused logits|value, state (2*Np, H) = [hn ; cn])."""
    TNp, Sp = s_flat.shape
    Np, H = h0.shape
    wh1, bh1, wh2, bh2, _ = _fuse_head_params(params)

    # pad net1 contraction dim (zero rows -> exact result)
    w1 = params["w1"]
    if w1.shape[0] != Sp:
        w1 = jnp.zeros((Sp, w1.shape[1]), jnp.float32).at[:w1.shape[0]].set(w1)

    out_shape = (
        jax.ShapeDtypeStruct((TNp, OUT_LANES), jnp.float32),   # fused logits|value
        jax.ShapeDtypeStruct((2 * Np, H), jnp.float32),        # fused [hn ; cn]
    )

    return pl.pallas_call(
        _mappo_kernel,
        out_shape=out_shape,
        compiler_params=pltpu.CompilerParams(vmem_limit_bytes=32 * 1024 * 1024),
    )(
        s_flat, h0, c0,
        w1, params["b1"],
        params["wih"], params["whh"], params["blstm"],
        wh1, bh1, wh2, bh2,
    )


# ----------------------------------------------------------------------------
# JAX-side wrapper replicating MAPPO.forward semantics.
# ----------------------------------------------------------------------------
def mappo_forward(params, input_d, sample_key):
    N, T = input_d["audio"].shape[0], input_d["audio"].shape[1]
    camera = input_d["camera"].reshape(N, T, -1)
    audio = input_d["audio"].reshape(N, T, -1)
    step = input_d["step"].reshape(N, T, -1)
    h0 = input_d["lstm_h"][:, 0, :]                             # (N, H)
    c0 = input_d["lstm_c"][:, 0, :]                             # (N, H)
    s = jnp.concatenate((camera, audio, step), axis=-1).astype(jnp.float32)  # (N, T, S)
    S = s.shape[-1]
    H = h0.shape[-1]
    A = params["wp2"].shape[1]

    # pad batch to a full 8-sublane tile and contraction dim to a 128-lane multiple
    Np = _round_up(max(N, 8), 8)
    Sp = _round_up(S, 128)
    s_pad = jnp.zeros((Np, T, Sp), jnp.float32).at[:N, :, :S].set(s)
    h0_pad = jnp.zeros((Np, H), jnp.float32).at[:N].set(h0.astype(jnp.float32))
    c0_pad = jnp.zeros((Np, H), jnp.float32).at[:N].set(c0.astype(jnp.float32))

    # time-major flatten so one time step is a contiguous, sublane-aligned row block
    s_flat = jnp.transpose(s_pad, (1, 0, 2)).reshape(T * Np, Sp)

    out_big, state = mappo_forward_core(s_flat, h0_pad, c0_pad, params)

    out3 = out_big.reshape(T, Np, OUT_LANES)[:, :N]             # (T, N, 128)
    pi_logits = jnp.transpose(out3[:, :, :A], (1, 0, 2))        # (N, T, 4)
    v_value = jnp.transpose(out3[:, :, A:A + 1], (1, 0, 2))     # (N, T, 1)
    hn = state[:N, :]                                           # (N, H)
    cn = state[Np:Np + N, :]                                    # (N, H)

    output_d = {}
    output_d["lstm_h"] = hn[:, None, :]                         # hn.permute(1,0,2) -> (N,1,H)
    output_d["lstm_c"] = cn[:, None, :]
    output_d["rl_pred"] = jax.random.categorical(sample_key, pi_logits, axis=-1)
    output_d["rl_logits"] = pi_logits
    output_d["rl_value"] = v_value
    return output_d


# ----------------------------------------------------------------------------
# Deterministic parameter construction (mirrors _build_model / _init_model).
# ----------------------------------------------------------------------------
def make_params(key, state_dim, hid_l, hid_p, hid_v, action_dim=4):
    ks = jax.random.split(key, 8)

    def trunc(k, shape, std=0.02):
        return (std * jax.random.truncated_normal(k, -2.0, 2.0, shape)).astype(jnp.float32)

    def uniform_linear(k, fan_in, shape):
        bound = 1.0 / jnp.sqrt(fan_in)
        return jax.random.uniform(k, shape, jnp.float32, -bound, bound)

    # PyTorch Linear stores weight as (out, in); we pre-transpose to (in, out).
    w1 = uniform_linear(ks[0], state_dim, (hid_l, state_dim)).T      # default init (net1)
    b1 = uniform_linear(ks[1], state_dim, (hid_l,))[None, :]
    wih = trunc(ks[2], (4 * hid_l, hid_l)).T
    whh = trunc(ks[3], (4 * hid_l, hid_l)).T
    blstm = jnp.zeros((1, 4 * hid_l), jnp.float32)                   # bias_ih + bias_hh = 0
    wp1 = trunc(ks[4], (hid_p, hid_l)).T
    bp1 = jnp.zeros((1, hid_p), jnp.float32)
    wp2 = trunc(ks[5], (action_dim, hid_p)).T
    bp2 = jnp.zeros((1, action_dim), jnp.float32)
    wv1 = trunc(ks[6], (hid_v, hid_l)).T
    bv1 = jnp.zeros((1, hid_v), jnp.float32)
    wv2 = trunc(ks[7], (1, hid_v)).T
    bv2 = jnp.zeros((1, 1), jnp.float32)

    return dict(w1=w1, b1=b1, wih=wih, whh=whh, blstm=blstm,
                wp1=wp1, bp1=bp1, wp2=wp2, bp2=bp2,
                wv1=wv1, bv1=bv1, wv2=wv2, bv2=bv2)


# ----------------------------------------------------------------------------
# Pure-JAX reference (for a built-in sanity check of the kernel).
# ----------------------------------------------------------------------------
def reference_forward(params, s, h0, c0):
    x = jax.nn.relu(jnp.einsum("nts,sh->nth", s, params["w1"]) + params["b1"])

    def cell(carry, x_t):
        h, c = carry
        gates = x_t @ params["wih"] + h @ params["whh"] + params["blstm"]
        H = h.shape[1]
        i = jax.nn.sigmoid(gates[:, :H])
        f = jax.nn.sigmoid(gates[:, H:2 * H])
        g = jnp.tanh(gates[:, 2 * H:3 * H])
        o = jax.nn.sigmoid(gates[:, 3 * H:])
        c_new = f * c + i * g
        h_new = o * jnp.tanh(c_new)
        return (h_new, c_new), h_new

    (hn, cn), hs = jax.lax.scan(cell, (h0, c0), jnp.transpose(x, (1, 0, 2)))
    lstm_out = jnp.transpose(hs, (1, 0, 2))
    pi_h = jax.nn.relu(lstm_out @ params["wp1"] + params["bp1"])
    logits = pi_h @ params["wp2"] + params["bp2"]
    v_h = jax.nn.relu(lstm_out @ params["wv1"] + params["bv1"])
    v = v_h @ params["wv2"] + params["bv2"]
    return logits, v, hn, cn


# ----------------------------------------------------------------------------
if __name__ == "__main__":
    # Small synthetic config: resolution=4, sample_rate=8, step_time=2
    #   state_dim = 4*4*4 + 8*2*2 + 1 = 97
    N, T = 2, 8
    resolution, sample_rate, step_time = 4, 8, 2
    hid_l = hid_p = hid_v = 32
    state_dim = resolution * resolution * 4 + sample_rate * step_time * 2 + 1

    key = jax.random.PRNGKey(0)
    k_param, k_cam, k_aud, k_stp, k_h, k_c, k_sample = jax.random.split(key, 7)

    params = make_params(k_param, state_dim, hid_l, hid_p, hid_v)

    input_d = {
        "camera": jax.random.normal(k_cam, (N, T, resolution, resolution, 4), jnp.float32),
        "audio": jax.random.normal(k_aud, (N, T, sample_rate * step_time, 2), jnp.float32),
        "step": jax.random.normal(k_stp, (N, T, 1), jnp.float32),
        "lstm_h": jax.random.normal(k_h, (N, 1, hid_l), jnp.float32),
        "lstm_c": jax.random.normal(k_c, (N, 1, hid_l), jnp.float32),
    }

    output_d = mappo_forward(params, input_d, k_sample)
    jax.block_until_ready(output_d)

    # sanity check against pure-JAX reference
    s = jnp.concatenate(
        (input_d["camera"].reshape(N, T, -1),
         input_d["audio"].reshape(N, T, -1),
         input_d["step"].reshape(N, T, -1)), axis=-1)
    ref_logits, ref_v, ref_hn, ref_cn = reference_forward(
        params, s, input_d["lstm_h"][:, 0, :], input_d["lstm_c"][:, 0, :])

    assert output_d["rl_logits"].shape == (N, T, 4)
    assert output_d["rl_value"].shape == (N, T, 1)
    assert output_d["lstm_h"].shape == (N, 1, hid_l)
    assert output_d["lstm_c"].shape == (N, 1, hid_l)
    assert output_d["rl_pred"].shape == (N, T)
    assert jnp.allclose(output_d["rl_logits"], ref_logits, atol=2e-4, rtol=1e-4)
    assert jnp.allclose(output_d["rl_value"], ref_v, atol=2e-4, rtol=1e-4)
    assert jnp.allclose(output_d["lstm_h"][:, 0, :], ref_hn, atol=2e-4, rtol=1e-4)
    assert jnp.allclose(output_d["lstm_c"][:, 0, :], ref_cn, atol=2e-4, rtol=1e-4)

    print("KERNEL_OK")
</pallas_src>

<mosaic_0001>
module attributes {stable_mosaic.version = 11 : i64} {
  func.func @_mappo_kernel(%arg0: memref<64x128xf32, #tpu.memory_space<vmem>>, %arg1: memref<8x32xf32, #tpu.memory_space<vmem>>, %arg2: memref<8x32xf32, #tpu.memory_space<vmem>>, %arg3: memref<128x32xf32, #tpu.memory_space<vmem>>, %arg4: memref<1x32xf32, #tpu.memory_space<vmem>>, %arg5: memref<32x128xf32, #tpu.memory_space<vmem>>, %arg6: memref<32x128xf32, #tpu.memory_space<vmem>>, %arg7: memref<1x128xf32, #tpu.memory_space<vmem>>, %arg8: memref<32x64xf32, #tpu.memory_space<vmem>>, %arg9: memref<1x64xf32, #tpu.memory_space<vmem>>, %arg10: memref<64x128xf32, #tpu.memory_space<vmem>>, %arg11: memref<1x128xf32, #tpu.memory_space<vmem>>, %arg12: memref<64x128xf32, #tpu.memory_space<vmem>>, %arg13: memref<16x32xf32, #tpu.memory_space<vmem>>) attributes {dimension_semantics = [], scalar_prefetch = 0 : i64, scratch_operands = 0 : i64, tpu.core_type = #tpu.core_type<tc>} {
    %c0 = arith.constant 0 : index
    %c0_0 = arith.constant 0 : index
    %0 = vector.load %arg0[%c0, %c0_0] : memref<64x128xf32, #tpu.memory_space<vmem>>, vector<64x128xf32>
    %c0_1 = arith.constant 0 : index
    %c0_2 = arith.constant 0 : index
    %1 = vector.load %arg3[%c0_1, %c0_2] : memref<128x32xf32, #tpu.memory_space<vmem>>, vector<128x32xf32>
    %cst = arith.constant dense<0.000000e+00> : vector<64x32xf32>
    %2 = tpu.matmul %0, %1, %cst {dimension_numbers = #tpu.dot_dimension_numbers<[1], [0], [0], [1], [0, 0, 1, 1], [], []>} : vector<64x128xf32>, vector<128x32xf32>, vector<64x32xf32> -> vector<64x32xf32>
    %c0_3 = arith.constant 0 : index
    %c0_4 = arith.constant 0 : index
    %3 = vector.load %arg4[%c0_3, %c0_4] : memref<1x32xf32, #tpu.memory_space<vmem>>, vector<1x32xf32>
    %4 = vector.broadcast %3 : vector<1x32xf32> to vector<64x32xf32>
    %5 = arith.addf %2, %4 : vector<64x32xf32>
    %cst_5 = arith.constant 0.000000e+00 : f32
    %6 = vector.broadcast %cst_5 : f32 to vector<64x32xf32>
    %7 = arith.maximumf %5, %6 : vector<64x32xf32>
    %c0_6 = arith.constant 0 : index
    %c0_7 = arith.constant 0 : index
    %8 = vector.load %arg5[%c0_6, %c0_7] : memref<32x128xf32, #tpu.memory_space<vmem>>, vector<32x128xf32>
    %cst_8 = arith.constant dense<0.000000e+00> : vector<64x128xf32>
    %9 = tpu.matmul %7, %8, %cst_8 {dimension_numbers = #tpu.dot_dimension_numbers<[1], [0], [0], [1], [0, 0, 1, 1], [], []>} : vector<64x32xf32>, vector<32x128xf32>, vector<64x128xf32> -> vector<64x128xf32>
    %c0_9 = arith.constant 0 : index
    %c0_10 = arith.constant 0 : index
    %10 = vector.load %arg7[%c0_9, %c0_10] : memref<1x128xf32, #tpu.memory_space<vmem>>, vector<1x128xf32>
    %11 = vector.broadcast %10 : vector<1x128xf32> to vector<64x128xf32>
    %12 = arith.addf %9, %11 : vector<64x128xf32>
    %c0_11 = arith.constant 0 : index
    %c0_12 = arith.constant 0 : index
    %13 = vector.load %arg6[%c0_11, %c0_12] : memref<32x128xf32, #tpu.memory_space<vmem>>, vector<32x128xf32>
    %14 = tpu.iota {dimensions = array<i32: 1>} : vector<8x128xi32>
    %c64_i32 = arith.constant 64 : i32
    %15 = vector.broadcast %c64_i32 : i32 to vector<8x128xi32>
    %16 = arith.cmpi sge, %14, %15 : vector<8x128xi32>
    %c96_i32 = arith.constant 96 : i32
    %17 = vector.broadcast %c96_i32 : i32 to vector<8x128xi32>
    %18 = arith.cmpi slt, %14, %17 : vector<8x128xi32>
    %19 = arith.andi %16, %18 : vector<8x128xi1>
    %cst_13 = arith.constant 1.000000e+00 : f32
    %cst_14 = arith.constant 5.000000e-01 : f32
    %20 = vector.broadcast %cst_13 : f32 to vector<8x128xf32>
    %21 = vector.broadcast %cst_14 : f32 to vector<8x128xf32>
    %22 = arith.select %19, %20, %21 : vector<8x128xi1>, vector<8x128xf32>
    %c0_15 = arith.constant 0 : index
    %c0_16 = arith.constant 0 : index
    %23 = vector.load %arg1[%c0_15, %c0_16] : memref<8x32xf32, #tpu.memory_space<vmem>>, vector<8x32xf32>
    %c0_17 = arith.constant 0 : index
    %c0_18 = arith.constant 0 : index
    %24 = vector.load %arg2[%c0_17, %c0_18] : memref<8x32xf32, #tpu.memory_space<vmem>>, vector<8x32xf32>
    %25 = vector.extract_strided_slice %12 {offsets = [0, 0], sizes = [8, 128], strides = [1, 1]} : vector<64x128xf32> to vector<8x128xf32>
    %cst_19 = arith.constant dense<0.000000e+00> : vector<8x128xf32>
    %26 = tpu.matmul %23, %13, %cst_19 {dimension_numbers = #tpu.dot_dimension_numbers<[1], [0], [0], [1], [0, 0, 1, 1], [], []>} : vector<8x32xf32>, vector<32x128xf32>, vector<8x128xf32> -> vector<8x128xf32>
    %27 = arith.addf %25, %26 : vector<8x128xf32>
    %28 = arith.mulf %27, %22 : vector<8x128xf32>
    %29 = math.tanh %28 : vector<8x128xf32>
    %cst_20 = arith.constant 5.000000e-01 : f32
    %30 = vector.broadcast %cst_20 : f32 to vector<8x128xf32>
    %31 = arith.mulf %30, %29 : vector<8x128xf32>
    %cst_21 = arith.constant 5.000000e-01 : f32
    %32 = vector.broadcast %cst_21 : f32 to vector<8x128xf32>
    %33 = arith.addf %31, %32 : vector<8x128xf32>
    %34 = arith.select %19, %29, %33 : vector<8x128xi1>, vector<8x128xf32>
    %35 = vector.extract_strided_slice %34 {offsets = [0, 0], sizes = [8, 32], strides = [1, 1]} : vector<8x128xf32> to vector<8x32xf32>
    %36 = vector.extract_strided_slice %34 {offsets = [0, 32], sizes = [8, 32], strides = [1, 1]} : vector<8x128xf32> to vector<8x32xf32>
    %37 = vector.extract_strided_slice %34 {offsets = [0, 64], sizes = [8, 32], strides = [1, 1]} : vector<8x128xf32> to vector<8x32xf32>
    %38 = vector.extract_strided_slice %34 {offsets = [0, 96], sizes = [8, 32], strides = [1, 1]} : vector<8x128xf32> to vector<8x32xf32>
    %39 = arith.mulf %36, %24 : vector<8x32xf32>
    %40 = arith.mulf %35, %37 : vector<8x32xf32>
    %41 = arith.addf %39, %40 : vector<8x32xf32>
    %42 = math.tanh %41 : vector<8x32xf32>
    %43 = arith.mulf %38, %42 : vector<8x32xf32>
    %44 = vector.extract_strided_slice %12 {offsets = [8, 0], sizes = [8, 128], strides = [1, 1]} : vector<64x128xf32> to vector<8x128xf32>
    %cst_22 = arith.constant dense<0.000000e+00> : vector<8x128xf32>
    %45 = tpu.matmul %43, %13, %cst_22 {dimension_numbers = #tpu.dot_dimension_numbers<[1], [0], [0], [1], [0, 0, 1, 1], [], []>} : vector<8x32xf32>, vector<32x128xf32>, vector<8x128xf32> -> vector<8x128xf32>
    %46 = arith.addf %44, %45 : vector<8x128xf32>
    %47 = arith.mulf %46, %22 : vector<8x128xf32>
    %48 = math.tanh %47 : vector<8x128xf32>
    %cst_23 = arith.constant 5.000000e-01 : f32
    %49 = vector.broadcast %cst_23 : f32 to vector<8x128xf32>
    %50 = arith.mulf %49, %48 : vector<8x128xf32>
    %cst_24 = arith.constant 5.000000e-01 : f32
    %51 = vector.broadcast %cst_24 : f32 to vector<8x128xf32>
    %52 = arith.addf %50, %51 : vector<8x128xf32>
    %53 = arith.select %19, %48, %52 : vector<8x128xi1>, vector<8x128xf32>
    %54 = vector.extract_strided_slice %53 {offsets = [0, 0], sizes = [8, 32], strides = [1, 1]} : vector<8x128xf32> to vector<8x32xf32>
    %55 = vector.extract_strided_slice %53 {offsets = [0, 32], sizes = [8, 32], strides = [1, 1]} : vector<8x128xf32> to vector<8x32xf32>
    %56 = vector.extract_strided_slice %53 {offsets = [0, 64], sizes = [8, 32], strides = [1, 1]} : vector<8x128xf32> to vector<8x32xf32>
    %57 = vector.extract_strided_slice %53 {offsets = [0, 96], sizes = [8, 32], strides = [1, 1]} : vector<8x128xf32> to vector<8x32xf32>
    %58 = arith.mulf %55, %41 : vector<8x32xf32>
    %59 = arith.mulf %54, %56 : vector<8x32xf32>
    %60 = arith.addf %58, %59 : vector<8x32xf32>
    %61 = math.tanh %60 : vector<8x32xf32>
    %62 = arith.mulf %57, %61 : vector<8x32xf32>
    %63 = vector.extract_strided_slice %12 {offsets = [16, 0], sizes = [8, 128], strides = [1, 1]} : vector<64x128xf32> to vector<8x128xf32>
    %cst_25 = arith.constant dense<0.000000e+00> : vector<8x128xf32>
    %64 = tpu.matmul %62, %13, %cst_25 {dimension_numbers = #tpu.dot_dimension_numbers<[1], [0], [0], [1], [0, 0, 1, 1], [], []>} : vector<8x32xf32>, vector<32x128xf32>, vector<8x128xf32> -> vector<8x128xf32>
    %65 = arith.addf %63, %64 : vector<8x128xf32>
    %66 = arith.mulf %65, %22 : vector<8x128xf32>
    %67 = math.tanh %66 : vector<8x128xf32>
    %cst_26 = arith.constant 5.000000e-01 : f32
    %68 = vector.broadcast %cst_26 : f32 to vector<8x128xf32>
    %69 = arith.mulf %68, %67 : vector<8x128xf32>
    %cst_27 = arith.constant 5.000000e-01 : f32
    %70 = vector.broadcast %cst_27 : f32 to vector<8x128xf32>
    %71 = arith.addf %69, %70 : vector<8x128xf32>
    %72 = arith.select %19, %67, %71 : vector<8x128xi1>, vector<8x128xf32>
    %73 = vector.extract_strided_slice %72 {offsets = [0, 0], sizes = [8, 32], strides = [1, 1]} : vector<8x128xf32> to vector<8x32xf32>
    %74 = vector.extract_strided_slice %72 {offsets = [0, 32], sizes = [8, 32], strides = [1, 1]} : vector<8x128xf32> to vector<8x32xf32>
    %75 = vector.extract_strided_slice %72 {offsets = [0, 64], sizes = [8, 32], strides = [1, 1]} : vector<8x128xf32> to vector<8x32xf32>
    %76 = vector.extract_strided_slice %72 {offsets = [0, 96], sizes = [8, 32], strides = [1, 1]} : vector<8x128xf32> to vector<8x32xf32>
    %77 = arith.mulf %74, %60 : vector<8x32xf32>
    %78 = arith.mulf %73, %75 : vector<8x32xf32>
    %79 = arith.addf %77, %78 : vector<8x32xf32>
    %80 = math.tanh %79 : vector<8x32xf32>
    %81 = arith.mulf %76, %80 : vector<8x32xf32>
    %82 = vector.extract_strided_slice %12 {offsets = [24, 0], sizes = [8, 128], strides = [1, 1]} : vector<64x128xf32> to vector<8x128xf32>
    %cst_28 = arith.constant dense<0.000000e+00> : vector<8x128xf32>
    %83 = tpu.matmul %81, %13, %cst_28 {dimension_numbers = #tpu.dot_dimension_numbers<[1], [0], [0], [1], [0, 0, 1, 1], [], []>} : vector<8x32xf32>, vector<32x128xf32>, vector<8x128xf32> -> vector<8x128xf32>
    %84 = arith.addf %82, %83 : vector<8x128xf32>
    %85 = arith.mulf %84, %22 : vector<8x128xf32>
    %86 = math.tanh %85 : vector<8x128xf32>
    %cst_29 = arith.constant 5.000000e-01 : f32
    %87 = vector.broadcast %cst_29 : f32 to vector<8x128xf32>
    %88 = arith.mulf %87, %86 : vector<8x128xf32>
    %cst_30 = arith.constant 5.000000e-01 : f32
    %89 = vector.broadcast %cst_30 : f32 to vector<8x128xf32>
    %90 = arith.addf %88, %89 : vector<8x128xf32>
    %91 = arith.select %19, %86, %90 : vector<8x128xi1>, vector<8x128xf32>
    %92 = vector.extract_strided_slice %91 {offsets = [0, 0], sizes = [8, 32], strides = [1, 1]} : vector<8x128xf32> to vector<8x32xf32>
    %93 = vector.extract_strided_slice %91 {offsets = [0, 32], sizes = [8, 32], strides = [1, 1]} : vector<8x128xf32> to vector<8x32xf32>
    %94 = vector.extract_strided_slice %91 {offsets = [0, 64], sizes = [8, 32], strides = [1, 1]} : vector<8x128xf32> to vector<8x32xf32>
    %95 = vector.extract_strided_slice %91 {offsets = [0, 96], sizes = [8, 32], strides = [1, 1]} : vector<8x128xf32> to vector<8x32xf32>
    %96 = arith.mulf %93, %79 : vector<8x32xf32>
    %97 = arith.mulf %92, %94 : vector<8x32xf32>
    %98 = arith.addf %96, %97 : vector<8x32xf32>
    %99 = math.tanh %98 : vector<8x32xf32>
    %100 = arith.mulf %95, %99 : vector<8x32xf32>
    %101 = vector.extract_strided_slice %12 {offsets = [32, 0], sizes = [8, 128], strides = [1, 1]} : vector<64x128xf32> to vector<8x128xf32>
    %cst_31 = arith.constant dense<0.000000e+00> : vector<8x128xf32>
    %102 = tpu.matmul %100, %13, %cst_31 {dimension_numbers = #tpu.dot_dimension_numbers<[1], [0], [0], [1], [0, 0, 1, 1], [], []>} : vector<8x32xf32>, vector<32x128xf32>, vector<8x128xf32> -> vector<8x128xf32>
    %103 = arith.addf %101, %102 : vector<8x128xf32>
    %104 = arith.mulf %103, %22 : vector<8x128xf32>
    %105 = math.tanh %104 : vector<8x128xf32>
    %cst_32 = arith.constant 5.000000e-01 : f32
    %106 = vector.broadcast %cst_32 : f32 to vector<8x128xf32>
    %107 = arith.mulf %106, %105 : vector<8x128xf32>
    %cst_33 = arith.constant 5.000000e-01 : f32
    %108 = vector.broadcast %cst_33 : f32 to vector<8x128xf32>
    %109 = arith.addf %107, %108 : vector<8x128xf32>
    %110 = arith.select %19, %105, %109 : vector<8x128xi1>, vector<8x128xf32>
    %111 = vector.extract_strided_slice %110 {offsets = [0, 0], sizes = [8, 32], strides = [1, 1]} : vector<8x128xf32> to vector<8x32xf32>
    %112 = vector.extract_strided_slice %110 {offsets = [0, 32], sizes = [8, 32], strides = [1, 1]} : vector<8x128xf32> to vector<8x32xf32>
    %113 = vector.extract_strided_slice %110 {offsets = [0, 64], sizes = [8, 32], strides = [1, 1]} : vector<8x128xf32> to vector<8x32xf32>
    %114 = vector.extract_strided_slice %110 {offsets = [0, 96], sizes = [8, 32], strides = [1, 1]} : vector<8x128xf32> to vector<8x32xf32>
    %115 = arith.mulf %112, %98 : vector<8x32xf32>
    %116 = arith.mulf %111, %113 : vector<8x32xf32>
    %117 = arith.addf %115, %116 : vector<8x32xf32>
    %118 = math.tanh %117 : vector<8x32xf32>
    %119 = arith.mulf %114, %118 : vector<8x32xf32>
    %120 = vector.extract_strided_slice %12 {offsets = [40, 0], sizes = [8, 128], strides = [1, 1]} : vector<64x128xf32> to vector<8x128xf32>
    %cst_34 = arith.constant dense<0.000000e+00> : vector<8x128xf32>
    %121 = tpu.matmul %119, %13, %cst_34 {dimension_numbers = #tpu.dot_dimension_numbers<[1], [0], [0], [1], [0, 0, 1, 1], [], []>} : vector<8x32xf32>, vector<32x128xf32>, vector<8x128xf32> -> vector<8x128xf32>
    %122 = arith.addf %120, %121 : vector<8x128xf32>
    %123 = arith.mulf %122, %22 : vector<8x128xf32>
    %124 = math.tanh %123 : vector<8x128xf32>
    %cst_35 = arith.constant 5.000000e-01 : f32
    %125 = vector.broadcast %cst_35 : f32 to vector<8x128xf32>
    %126 = arith.mulf %125, %124 : vector<8x128xf32>
    %cst_36 = arith.constant 5.000000e-01 : f32
    %127 = vector.broadcast %cst_36 : f32 to vector<8x128xf32>
    %128 = arith.addf %126, %127 : vector<8x128xf32>
    %129 = arith.select %19, %124, %128 : vector<8x128xi1>, vector<8x128xf32>
    %130 = vector.extract_strided_slice %129 {offsets = [0, 0], sizes = [8, 32], strides = [1, 1]} : vector<8x128xf32> to vector<8x32xf32>
    %131 = vector.extract_strided_slice %129 {offsets = [0, 32], sizes = [8, 32], strides = [1, 1]} : vector<8x128xf32> to vector<8x32xf32>
    %132 = vector.extract_strided_slice %129 {offsets = [0, 64], sizes = [8, 32], strides = [1, 1]} : vector<8x128xf32> to vector<8x32xf32>
    %133 = vector.extract_strided_slice %129 {offsets = [0, 96], sizes = [8, 32], strides = [1, 1]} : vector<8x128xf32> to vector<8x32xf32>
    %134 = arith.mulf %131, %117 : vector<8x32xf32>
    %135 = arith.mulf %130, %132 : vector<8x32xf32>
    %136 = arith.addf %134, %135 : vector<8x32xf32>
    %137 = math.tanh %136 : vector<8x32xf32>
    %138 = arith.mulf %133, %137 : vector<8x32xf32>
    %139 = vector.extract_strided_slice %12 {offsets = [48, 0], sizes = [8, 128], strides = [1, 1]} : vector<64x128xf32> to vector<8x128xf32>
    %cst_37 = arith.constant dense<0.000000e+00> : vector<8x128xf32>
    %140 = tpu.matmul %138, %13, %cst_37 {dimension_numbers = #tpu.dot_dimension_numbers<[1], [0], [0], [1], [0, 0, 1, 1], [], []>} : vector<8x32xf32>, vector<32x128xf32>, vector<8x128xf32> -> vector<8x128xf32>
    %141 = arith.addf %139, %140 : vector<8x128xf32>
    %142 = arith.mulf %141, %22 : vector<8x128xf32>
    %143 = math.tanh %142 : vector<8x128xf32>
    %cst_38 = arith.constant 5.000000e-01 : f32
    %144 = vector.broadcast %cst_38 : f32 to vector<8x128xf32>
    %145 = arith.mulf %144, %143 : vector<8x128xf32>
    %cst_39 = arith.constant 5.000000e-01 : f32
    %146 = vector.broadcast %cst_39 : f32 to vector<8x128xf32>
    %147 = arith.addf %145, %146 : vector<8x128xf32>
    %148 = arith.select %19, %143, %147 : vector<8x128xi1>, vector<8x128xf32>
    %149 = vector.extract_strided_slice %148 {offsets = [0, 0], sizes = [8, 32], strides = [1, 1]} : vector<8x128xf32> to vector<8x32xf32>
    %150 = vector.extract_strided_slice %148 {offsets = [0, 32], sizes = [8, 32], strides = [1, 1]} : vector<8x128xf32> to vector<8x32xf32>
    %151 = vector.extract_strided_slice %148 {offsets = [0, 64], sizes = [8, 32], strides = [1, 1]} : vector<8x128xf32> to vector<8x32xf32>
    %152 = vector.extract_strided_slice %148 {offsets = [0, 96], sizes = [8, 32], strides = [1, 1]} : vector<8x128xf32> to vector<8x32xf32>
    %153 = arith.mulf %150, %136 : vector<8x32xf32>
    %154 = arith.mulf %149, %151 : vector<8x32xf32>
    %155 = arith.addf %153, %154 : vector<8x32xf32>
    %156 = math.tanh %155 : vector<8x32xf32>
    %157 = arith.mulf %152, %156 : vector<8x32xf32>
    %158 = vector.extract_strided_slice %12 {offsets = [56, 0], sizes = [8, 128], strides = [1, 1]} : vector<64x128xf32> to vector<8x128xf32>
    %cst_40 = arith.constant dense<0.000000e+00> : vector<8x128xf32>
    %159 = tpu.matmul %157, %13, %cst_40 {dimension_numbers = #tpu.dot_dimension_numbers<[1], [0], [0], [1], [0, 0, 1, 1], [], []>} : vector<8x32xf32>, vector<32x128xf32>, vector<8x128xf32> -> vector<8x128xf32>
    %160 = arith.addf %158, %159 : vector<8x128xf32>
    %161 = arith.mulf %160, %22 : vector<8x128xf32>
    %162 = math.tanh %161 : vector<8x128xf32>
    %cst_41 = arith.constant 5.000000e-01 : f32
    %163 = vector.broadcast %cst_41 : f32 to vector<8x128xf32>
    %164 = arith.mulf %163, %162 : vector<8x128xf32>
    %cst_42 = arith.constant 5.000000e-01 : f32
    %165 = vector.broadcast %cst_42 : f32 to vector<8x128xf32>
    %166 = arith.addf %164, %165 : vector<8x128xf32>
    %167 = arith.select %19, %162, %166 : vector<8x128xi1>, vector<8x128xf32>
    %168 = vector.extract_strided_slice %167 {offsets = [0, 0], sizes = [8, 32], strides = [1, 1]} : vector<8x128xf32> to vector<8x32xf32>
    %169 = vector.extract_strided_slice %167 {offsets = [0, 32], sizes = [8, 32], strides = [1, 1]} : vector<8x128xf32> to vector<8x32xf32>
    %170 = vector.extract_strided_slice %167 {offsets = [0, 64], sizes = [8, 32], strides = [1, 1]} : vector<8x128xf32> to vector<8x32xf32>
    %171 = vector.extract_strided_slice %167 {offsets = [0, 96], sizes = [8, 32], strides = [1, 1]} : vector<8x128xf32> to vector<8x32xf32>
    %172 = arith.mulf %169, %155 : vector<8x32xf32>
    %173 = arith.mulf %168, %170 : vector<8x32xf32>
    %174 = arith.addf %172, %173 : vector<8x32xf32>
    %175 = math.tanh %174 : vector<8x32xf32>
    %176 = arith.mulf %171, %175 : vector<8x32xf32>
    %177 = tpu.concatenate %176, %174 in 0 : vector<8x32xf32>, vector<8x32xf32> -> vector<16x32xf32>
    %c0_43 = arith.constant 0 : index
    %c0_44 = arith.constant 0 : index
    %178 = vector.load %arg13[%c0_43, %c0_44] : memref<16x32xf32, #tpu.memory_space<vmem>>, vector<16x32xf32>
    tpu.vector_store %arg13[%c0_43, %c0_44], %177 {strides = array<i32>} : memref<16x32xf32, #tpu.memory_space<vmem>>, vector<16x32xf32>,
    %179 = tpu.concatenate %43, %62, %81, %100, %119, %138, %157, %176 in 0 : vector<8x32xf32>, vector<8x32xf32>, vector<8x32xf32>, vector<8x32xf32>, vector<8x32xf32>, vector<8x32xf32>, vector<8x32xf32>, vector<8x32xf32> -> vector<64x32xf32>
    %c0_45 = arith.constant 0 : index
    %c0_46 = arith.constant 0 : index
    %180 = vector.load %arg8[%c0_45, %c0_46] : memref<32x64xf32, #tpu.memory_space<vmem>>, vector<32x64xf32>
    %cst_47 = arith.constant dense<0.000000e+00> : vector<64x64xf32>
    %181 = tpu.matmul %179, %180, %cst_47 {dimension_numbers = #tpu.dot_dimension_numbers<[1], [0], [0], [1], [0, 0, 1, 1], [], []>} : vector<64x32xf32>, vector<32x64xf32>, vector<64x64xf32> -> vector<64x64xf32>
    %c0_48 = arith.constant 0 : index
    %c0_49 = arith.constant 0 : index
    %182 = vector.load %arg9[%c0_48, %c0_49] : memref<1x64xf32, #tpu.memory_space<vmem>>, vector<1x64xf32>
    %183 = vector.broadcast %182 : vector<1x64xf32> to vector<64x64xf32>
    %184 = arith.addf %181, %183 : vector<64x64xf32>
    %cst_50 = arith.constant 0.000000e+00 : f32
    %185 = vector.broadcast %cst_50 : f32 to vector<64x64xf32>
    %186 = arith.maximumf %184, %185 : vector<64x64xf32>
    %c0_51 = arith.constant 0 : index
    %c0_52 = arith.constant 0 : index
    %187 = vector.load %arg10[%c0_51, %c0_52] : memref<64x128xf32, #tpu.memory_space<vmem>>, vector<64x128xf32>
    %cst_53 = arith.constant dense<0.000000e+00> : vector<64x128xf32>
    %188 = tpu.matmul %186, %187, %cst_53 {dimension_numbers = #tpu.dot_dimension_numbers<[1], [0], [0], [1], [0, 0, 1, 1], [], []>} : vector<64x64xf32>, vector<64x128xf32>, vector<64x128xf32> -> vector<64x128xf32>
    %c0_54 = arith.constant 0 : index
    %c0_55 = arith.constant 0 : index
    %189 = vector.load %arg11[%c0_54, %c0_55] : memref<1x128xf32, #tpu.memory_space<vmem>>, vector<1x128xf32>
    %190 = vector.broadcast %189 : vector<1x128xf32> to vector<64x128xf32>
    %191 = arith.addf %188, %190 : vector<64x128xf32>
    %c0_56 = arith.constant 0 : index
    %c0_57 = arith.constant 0 : index
    %192 = vector.load %arg12[%c0_56, %c0_57] : memref<64x128xf32, #tpu.memory_space<vmem>>, vector<64x128xf32>
    tpu.vector_store %arg12[%c0_56, %c0_57], %191 {strides = array<i32>} : memref<64x128xf32, #tpu.memory_space<vmem>>, vector<64x128xf32>,
    return
  }
}

</mosaic_0001>

<bundles_post_ra>
// kernel: tpu_custom_call.1
= control target key start
LH: loop header
LB: loop body
LE: loop exit
PB: predicated region body
PF: predicated region fallthrough
CT: control target
= control target key end

     0   :  { %19 = vsyncpa [#allocation3], 0  ;;  %s2644_s0 = inlined_call_operand.vmem [shape: f32[64,128], index: 0, kind: input, shape index: {}]   ;;  %s2645_s1 = inlined_call_operand.hbm [shape: f32[8,32], index: 1, kind: input, shape index: {}]   ;;  %s2646_s2 = inlined_call_operand.hbm [shape: f32[8,32], index: 2, kind: input, shape index: {}]   ;;  %s2647_s3 = inlined_call_operand.vmem [shape: f32[128,32], index: 3, kind: input, shape index: {}]   ;;  %s2648_s4 = inlined_call_operand.vmem [shape: f32[1,32], index: 4, kind: input, shape index: {}]   ;;  %s2649_s5 = inlined_call_operand.vmem [shape: f32[32,128], index: 5, kind: input, shape index: {}]   ;;  %s2650_s6 = inlined_call_operand.hbm [shape: f32[32,128], index: 6, kind: input, shape index: {}]   ;;  %s2651_s7 = inlined_call_operand.vmem [shape: f32[1,128], index: 7, kind: input, shape index: {}]   ;;  %s2652_s8 = inlined_call_operand.hbm [shape: f32[32,64], index: 8, kind: input, shape index: {}]   ;;  %s2653_s9 = inlined_call_operand.vmem [shape: f32[1,64], index: 9, kind: input, shape index: {}]   ;;  %s2654_s10 = inlined_call_operand.vmem [shape: f32[64,128], index: 10, kind: input, shape index: {}]   ;;  %s2655_s11 = inlined_call_operand.vmem [shape: f32[1,128], index: 11, kind: input, shape index: {}]   ;;  %s2656_s12 = inlined_call_operand.hbm [shape: f32[64,128], index: 12, kind: output, shape index: {0}]   ;;  %s2657_s13 = inlined_call_operand.hbm [shape: f32[16,32], index: 13, kind: output, shape index: {1}]  }
   0x1   :  { %20 = vsyncpa [#allocation6], 0 }
   0x2   :  { %21 = vsyncpa [#allocation9], 0 }
   0x3   :  { %22 = vsyncpa [#allocation4], 0 }
   0x4   :  { %23 = vsyncpa [#allocation12], 0  ;;  %s2145_s25 = smov [#allocation5]   ;;  %s2146_s27 = smov [#allocation2]  }
   0x5   :  { %s42_s26 = sshll.u32 %s2145_s25, 4  ;;  %s32_s28 = sshll.u32 %s2146_s27, 4  ;;  %s43_s26 = int_to_ptr.vmem [resolvable:$true] %s42_s26  ;;  %s33_s28 = int_to_ptr.vmem [resolvable:$true] %s32_s28 }
   0x6   :  { %s2003_s14 = scalar_lea.hbm %s2646_s2, 128 }
   0x7   :  { %p2004_p0 = scmp.ne.s32.totalorder %s2646_s2, %s2003_s14  ;;  %p2007_p1 = scmp.lt.u32.totalorder %s2003_s14, %s2646_s2 }
   0x9   :  { %p2009_p2 = pnand %p2007_p1, %p2004_p0 }
   0xb   :  { %2012 = shalt.err (!%p2009_p2)
}
   0xc   :  { %s2013_s19 = scalar_lea.vmem %s43_s26, 128  ;;  %p2018_p4 = scmp.lt.s32.totalorder %s43_s26, %s43_s26 }
   0xd   :  { %p2014_p3 = scmp.ne.s32.totalorder %s43_s26, %s2013_s19  ;;  %p2019_p5 = scmp.lt.s32.totalorder %s2013_s19, %s2013_s19 }
   0xf   :  { %p2020_p6 = por %p2019_p5, %p2018_p4 }
  0x11   :  { %p2021_p7 = pnand %p2020_p6, %p2014_p3 }
  0x13   :  { %2024 = shalt.err (!%p2021_p7)
}
  0x14   :  { %45 = dma.hbm_to_vmem [thread:$0]  %s2646_s2, 128, %s43_s26, [#allocation6]  }
  0x15   :  { %s2025_s24 = scalar_lea.hbm %s2645_s1, 128 }
  0x16   :  { %p2026_p8 = scmp.ne.s32.totalorder %s2645_s1, %s2025_s24  ;;  %p2029_p9 = scmp.lt.u32.totalorder %s2025_s24, %s2645_s1 }
  0x18   :  { %p2031_p10 = pnand %p2029_p9, %p2026_p8 }
  0x1a   :  { %2034 = shalt.err (!%p2031_p10)
}
  0x1b   :  { %s2035_s14 = scalar_lea.vmem %s33_s28, 128  ;;  %p2040_p12 = scmp.lt.s32.totalorder %s33_s28, %s33_s28 }
  0x1c   :  { %p2036_p11 = scmp.ne.s32.totalorder %s33_s28, %s2035_s14  ;;  %p2041_p13 = scmp.lt.s32.totalorder %s2035_s14, %s2035_s14 }
  0x1e   :  { %p2042_p0 = por %p2041_p13, %p2040_p12 }
  0x20   :  { %p2043_p1 = pnand %p2042_p0, %p2036_p11 }
  0x22   :  { %2046 = shalt.err (!%p2043_p1)
}
  0x23   :  { %35 = dma.hbm_to_vmem [thread:$0]  %s2645_s1, 128, %s33_s28, [#allocation3]  }
  0x24   :  { %s2147_s15 = smov [#allocation7]   ;;  %s2047_s19 = scalar_lea.hbm %s2650_s6, 512 }
  0x25   :  { %s57_s16 = sshll.u32 %s2147_s15, 4  ;;  %p2048_p2 = scmp.ne.s32.totalorder %s2650_s6, %s2047_s19  ;;  %s58_s16 = int_to_ptr.vmem [resolvable:$true] %s57_s16 }
  0x26   :  { %p2051_p3 = scmp.lt.u32.totalorder %s2047_s19, %s2650_s6 }
  0x28   :  { %p2053_p4 = pnand %p2051_p3, %p2048_p2 }
  0x2a   :  { %2056 = shalt.err (!%p2053_p4)
}
  0x2b   :  { %s2057_s24 = scalar_lea.vmem %s58_s16, 512  ;;  %p2062_p6 = scmp.lt.s32.totalorder %s58_s16, %s58_s16 }
  0x2c   :  { %p2058_p5 = scmp.ne.s32.totalorder %s58_s16, %s2057_s24  ;;  %p2063_p7 = scmp.lt.s32.totalorder %s2057_s24, %s2057_s24 }
  0x2e   :  { %p2064_p8 = por %p2063_p7, %p2062_p6 }
  0x30   :  { %p2065_p9 = pnand %p2064_p8, %p2058_p5 }
  0x32   :  { %2068 = shalt.err (!%p2065_p9)
}
  0x33   :  { %s2148_s1 = smov 128   ;;  %s2149_s28 = smov 8  }
  0x34   :  { %63 = dma.hbm_to_vmem [thread:$0]  %s2650_s6, 512, %s58_s16, [#allocation6], %s2148_s1, %s2148_s1, %s2149_s28  }
  0x35   :  { %s2150_s29 = smov [#allocation8]   ;;  %s2069_s26 = scalar_lea.hbm %s2652_s8, 512 }
  0x36   :  { %s71_s30 = sshll.u32 %s2150_s29, 4  ;;  %p2070_p10 = scmp.ne.s32.totalorder %s2652_s8, %s2069_s26  ;;  %s72_s30 = int_to_ptr.vmem [resolvable:$true] %s71_s30 }
  0x37   :  { %p2073_p11 = scmp.lt.u32.totalorder %s2069_s26, %s2652_s8 }
  0x39   :  { %p2075_p12 = pnand %p2073_p11, %p2070_p10 }
  0x3b   :  { %2078 = shalt.err (!%p2075_p12)
}
  0x3c   :  { %s2079_s20 = scalar_lea.vmem %s72_s30, 512  ;;  %p2084_p0 = scmp.lt.s32.totalorder %s72_s30, %s72_s30 }
  0x3d   :  { %p2080_p13 = scmp.ne.s32.totalorder %s72_s30, %s2079_s20  ;;  %p2085_p1 = scmp.lt.s32.totalorder %s2079_s20, %s2079_s20 }
  0x3f   :  { %p2086_p2 = por %p2085_p1, %p2084_p0 }
  0x41   :  { %p2087_p3 = pnand %p2086_p2, %p2080_p13 }
  0x43   :  { %2090 = shalt.err (!%p2087_p3)
}
  0x44   :  { %77 = dma.hbm_to_vmem [thread:$0]  %s2652_s8, 512, %s72_s30, [#allocation9], %s2148_s1, %s2148_s1, %s2149_s28  }
  0x45   :  { %2135 = dma.done.wait [#allocation3], 128  }
  0x46   :  { %2136 = vsyncadd [#allocation3], 4294967168 }
  0x47   :  { %2137 = dma.done.wait [#allocation6], 640  }
  0x48   :  { %2138 = vsyncadd [#allocation6], 4294966656 }
  0x49   :  { %2139 = dma.done.wait [#allocation9], 512  }
  0x4a   :  { %2140 = vsyncadd [#allocation9], 4294966784  ;;  %v104_v0 = vld [vmem:[%s2647_s3] sm:$0xff]  ;;  %v105_v1 = vld [vmem:[%s2647_s3 + $0x8] sm:$0xff]  ;;  %v2151_v40 = vmov 0.0|0.0   ;;  %vm2152_vm0 = vmmov 0  }
  0x4b   :  { %v106_v2 = vld [vmem:[%s2647_s3 + $0x10] sm:$0xff]  ;;  %v1845_v3 = vpack.c.bf16 %v105_v1, %v104_v0  ;;  %v107_v4 = vld [vmem:[%s2647_s3 + $0x18] sm:$0xff]  ;;  %v108_v6 = vld [vmem:[%s2647_s3 + $0x20] sm:$0xff]  ;;  %v2153_v45 = vmov 0.0   ;;  %vm251_vm1 = vcmask 261120   ;;  %s2156_s16 = smov 32  }
  0x4c   :  { %v1849_v5 = vpack.c.bf16 %v107_v4, %v106_v2  ;;  %v109_v7 = vld [vmem:[%s2647_s3 + $0x28] sm:$0xff]  ;;  %v96_v9 = vld [vmem:[%s2644_s0] sm:$0xff]  ;;  %v110_v10 = vld [vmem:[%s2647_s3 + $0x30] sm:$0xff]  ;;  %vm1332_vm5 = vcmask 523264  }
  0x4d   :  { %1846 = vmatprep.subr.bf16.mxu0 %v1845_v3  ;;  %v1853_v8 = vpack.c.bf16 %v109_v7, %v108_v6  ;;  %v111_v11 = vld [vmem:[%s2647_s3 + $0x38] sm:$0xff]  ;;  %1677 = vmatprep.mubr.f32.mxu0 %v96_v9  ;;  %v240_v12 = vld [vmem:[%s2649_s5] sm:$0xff]  ;;  %v241_v13 = vld [vmem:[%s2649_s5 + $0x8] sm:$0xff] }
  0x4e   :  { %1848 = vmatpush3.bf16.msra.mxu0 %v1845_v3  ;;  %v1857_v14 = vpack.c.bf16 %v111_v11, %v110_v10  ;;  %v1877_v15 = vpack.c.bf16 %v241_v13, %v240_v12  ;;  %v112_v16 = vld [vmem:[%s2647_s3 + $0x40] sm:$0xff]  ;;  %v113_v17 = vld [vmem:[%s2647_s3 + $0x48] sm:$0xff]  ;;  %v114_v19 = vld [vmem:[%s2647_s3 + $0x50] sm:$0xff]  ;;  %v385_v12 = vlaneseq }
  0x4f   :  { %1850 = vmatprep.subr.bf16.mxu0 %v1849_v5  ;;  %v1861_v18 = vpack.c.bf16 %v113_v17, %v112_v16  ;;  %v115_v20 = vld [vmem:[%s2647_s3 + $0x58] sm:$0xff]  ;;  %v116_v22 = vld [vmem:[%s2647_s3 + $0x60] sm:$0xff]  ;;  %v117_v23 = vld [vmem:[%s2647_s3 + $0x68] sm:$0xff] }
  0x50   :  { %1878 = vmatprep.subr.bf16.mxu1 %v1877_v15  ;;  %v1865_v21 = vpack.c.bf16 %v115_v20, %v114_v19  ;;  %v1869_v24 = vpack.c.bf16 %v117_v23, %v116_v22  ;;  %v118_v25 = vld [vmem:[%s2647_s3 + $0x70] sm:$0xff]  ;;  %v119_v26 = vld [vmem:[%s2647_s3 + $0x78] sm:$0xff]  ;;  %v97_v28 = vld [vmem:[%s2644_s0 + $0x8] sm:$0xff]  ;;  %v386_v17 = vand.u32 127, %v385_v12 }
  0x51   :  { %1880 = vmatpush3.bf16.msra.mxu1 %v1877_v15  ;;  %v1873_v27 = vpack.c.bf16 %v119_v26, %v118_v25  ;;  %v98_v29 = vld [vmem:[%s2644_s0 + $0x10] sm:$0xff]  ;;  %v99_v30 = vld [vmem:[%s2644_s0 + $0x18] sm:$0xff]  ;;  %v100_v31 = vld [vmem:[%s2644_s0 + $0x20] sm:$0xff] }
  0x52   :  { %1852 = vmatpush3.bf16.msra.mxu0 %v1849_v5  ;;  %v101_v32 = vld [vmem:[%s2644_s0 + $0x28] sm:$0xff]  ;;  %v102_v33 = vld [vmem:[%s2644_s0 + $0x30] sm:$0xff]  ;;  %v103_v34 = vld [vmem:[%s2644_s0 + $0x38] sm:$0xff]  ;;  %vm387_vm2 = vcmp.ge.s32.totalorder %v386_v17, 64  ;;  %vm388_vm3 = vcmp.lt.s32.totalorder %v386_v17, 96 }
  0x53   :  { %1854 = vmatprep.subr.bf16.mxu0 %v1853_v8  ;;  %v242_v35 = vld [vmem:[%s2649_s5 + $0x10] sm:$0xff]  ;;  %v243_v36 = vld [vmem:[%s2649_s5 + $0x18] sm:$0xff]  ;;  %v383_v42 = vld [vmem:[#allocation7 + $0x10] sm:$0xff] }
  0x54   :  { %v1881_v37 = vpack.c.bf16 %v243_v36, %v242_v35  ;;  %v381_v38 = vld [vmem:[#allocation7] sm:$0xff]  ;;  %v382_v39 = vld [vmem:[#allocation7 + $0x8] sm:$0xff]  ;;  %v384_v43 = vld [vmem:[#allocation7 + $0x18] sm:$0xff] }
  0x55   :  { %v2368_v41 = vpack.c.bf16 %v382_v39, %v381_v38  ;;  %v2373_v44 = vpack.c.bf16 %v384_v43, %v383_v42  ;;  %v1505_v46 = vld [vmem:[%s2648_s4] ss:$0 sm:$0xff]  ;;  %vm2416_vm4 = vmand %vm387_vm2, %vm388_vm3  ;;  %v392_v38 = vld [vmem:[#allocation5] sm:$0xff] }
  0x56   :  { %1856 = vmatpush3.bf16.msra.mxu0 %v1853_v8  ;;  %1882 = vmatprep.subr.bf16.mxu1 %v1881_v37  ;;  %v391_v7 = vld [vmem:[#allocation2] sm:$0xff] }
  0x57   :  { %1858 = vmatprep.subr.bf16.mxu0 %v1857_v14  ;;  %1884 = vmatpush3.bf16.msra.mxu1 %v1881_v37  ;;  %v1506_v8 = vld [vmem:[%s2651_s7] ss:$0 sm:$0xff]  ;;  %s2155_s7 = smov 64  }
  0x58   :  { %1885 = vmatprep.subr.bf16.mxu1 %v2151_v40 }
  0x5a   :  { %1860 = vmatpush3.bf16.msra.mxu0 %v1857_v14 }
  0x5b   :  { %1862 = vmatprep.subr.bf16.mxu0 %v1861_v18 }
  0x5e   :  { %1864 = vmatpush3.bf16.msra.mxu0 %v1861_v18 }
  0x5f   :  { %1866 = vmatprep.subr.bf16.mxu0 %v1865_v21 }
  0x62   :  { %1868 = vmatpush3.bf16.msra.mxu0 %v1865_v21 }
  0x63   :  { %1870 = vmatprep.subr.bf16.mxu0 %v1869_v24 }
  0x66   :  { %1872 = vmatpush3.bf16.msra.mxu0 %v1869_v24 }
  0x67   :  { %1874 = vmatprep.subr.bf16.mxu0 %v1873_v27 }
  0x6a   :  { %1876 = vmatpush3.bf16.msra.mxu0 %v1873_v27 }
  0x6b   :  { %1915 = vmatprep.subr.bf16.mxu0 %v2151_v40 }
  0x6d   :  { %1678 = vmatmul.mubr.f32.vlgmr.msra.gmra.mrb[0].mxu0 %v97_v28  ;;  %v2154_v28 = vmov 0.5  }
  0x6e   :  { %1680 = vmatprep.mubr.f32.mxu0 %v98_v29  ;;  %1917 = vmatpush3.bf16.msra.mxu0 %v2368_v41  ;;  %v2424_v29 = vsel %vm2416_vm4, 1.0, %v2154_v28 }
  0x6f   :  { %1918 = vmatprep.subr.bf16.mxu0 %v2151_v40 }
  0x71   :  { %1681 = vmatmul.mubr.f32.gmra.mrb[2].mxu0 %v99_v30 }
  0x72   :  { %1683 = vmatprep.mubr.f32.mxu0 %v100_v31  ;;  %1920 = vmatpush3.bf16.msra.mxu0 %v2373_v44 }
  0x73   :  { %1927 = vmatprep.subr.bf16.mxu0 %v2151_v40 }
  0x75   :  { %1684 = vmatmul.mubr.f32.gmra.mrb[4].mxu0 %v101_v32 }
  0x76   :  { %1686 = vmatprep.mubr.f32.mxu0 %v102_v33 }
  0x79   :  { %1687 = vmatmul.mubr.f32.gmra.mrb[6].mxu0 %v103_v34 }
  0x7a   :  { %1772 = vmatprep.mubr.msk.f32.mxu0 %vm2152_vm0, %v2153_v45 }
 0x140   :  { %v1679_v47 = vpop.f32.mrb[0].mxu0 }
 0x141   :  { %v199_v48 = vadd.f32 %v1679_v47, %v1505_v46  ;;  %v193_v49 = vpop.f32.mrb[1].mxu0 }
 0x142   :  { %v194_v50 = vadd.f32 %v1505_v46, %v193_v49 }
 0x143   :  { %v233_v53 = vmax.f32 %v199_v48, 0.0 }
 0x144   :  { %v232_v51 = vmax.f32 %v194_v50, 0.0  ;;  %v1682_v52 = vpop.f32.mrb[2].mxu0 }
 0x145   :  { %v209_v54 = vadd.f32 %v1682_v52, %v1505_v46  ;;  %v203_v55 = vpop.f32.mrb[3].mxu0 }
 0x146   :  { %v204_v56 = vadd.f32 %v1505_v46, %v203_v55  ;;  %1697 = vmatprep.mubr.msk.f32.mxu1 %vm251_vm1, %v232_v51 }
 0x147   :  { %1698 = vmatmul.mubr.msk.f32.vlgmr.msra.gmra.mrb[0].mxu1 %vm251_vm1, %v233_v53  ;;  %v235_v59 = vmax.f32 %v209_v54, 0.0 }
 0x148   :  { %v234_v57 = vmax.f32 %v204_v56, 0.0  ;;  %1887 = vmatpush3.bf16.msra.mxu1 %v2368_v41  ;;  %v1685_v58 = vpop.f32.mrb[4].mxu0 }
 0x149   :  { %v219_v60 = vadd.f32 %v1685_v58, %v1505_v46  ;;  %v213_v61 = vpop.f32.mrb[5].mxu0  ;;  %1888 = vmatprep.subr.bf16.mxu1 %v2151_v40 }
 0x14a   :  { %v214_v62 = vadd.f32 %v1505_v46, %v213_v61  ;;  %1700 = vmatprep.mubr.msk.f32.mxu1 %vm251_vm1, %v234_v57 }
 0x14b   :  { %1701 = vmatmul.mubr.msk.f32.gmra.mrb[2].mxu1 %vm251_vm1, %v235_v59  ;;  %v237_v1 = vmax.f32 %v219_v60, 0.0 }
 0x14c   :  { %v236_v63 = vmax.f32 %v214_v62, 0.0  ;;  %v1688_v0 = vpop.f32.mrb[6].mxu0  ;;  %1890 = vmatpush3.bf16.msra.mxu1 %v2373_v44 }
 0x14d   :  { %v229_v2 = vadd.f32 %v1688_v0, %v1505_v46  ;;  %v223_v3 = vpop.f32.mrb[7].mxu0  ;;  %1891 = vmatprep.subr.bf16.mxu1 %v2151_v40 }
 0x14e   :  { %v224_v4 = vadd.f32 %v1505_v46, %v223_v3  ;;  %1703 = vmatprep.mubr.msk.f32.mxu1 %vm251_vm1, %v236_v63 }
 0x14f   :  { %1704 = vmatmul.mubr.msk.f32.gmra.mrb[4].mxu1 %vm251_vm1, %v237_v1  ;;  %v239_v6 = vmax.f32 %v229_v2, 0.0 }
 0x150   :  { %v238_v5 = vmax.f32 %v224_v4, 0.0 }
 0x152   :  { %1706 = vmatprep.mubr.msk.f32.mxu1 %vm251_vm1, %v238_v5 }
 0x153   :  { %1707 = vmatmul.mubr.msk.f32.gmra.mrb[6].mxu1 %vm251_vm1, %v239_v6 }
 0x154   :  { %1717 = vmatprep.mubr.msk.f32.mxu1 %vm2152_vm0, %v2153_v45 }
 0x157   :  { %1718 = vmatmul.mubr.msk.f32.vlgmr.msra.gmra.mrb[8].mxu1 %vm251_vm1, %v391_v7 }
 0x158   :  { %1893 = vmatpush3.bf16.msra.mxu1 %v2368_v41  ;;  %1728 = vmatprep.mubr.msk.f32.mxu1 %vm2152_vm0, %v2153_v45 }
 0x159   :  { %1894 = vmatprep.subr.bf16.mxu1 %v2151_v40 }
 0x15c   :  { %1896 = vmatpush3.bf16.msra.mxu1 %v2373_v44 }
 0x15d   :  { %1897 = vmatprep.subr.bf16.mxu1 %v2151_v40 }
 0x21a   :  { %v1699_v9 = vpop.f32.mrb[0].mxu1 }
 0x21b   :  { %v348_v10 = vadd.f32 %v1699_v9, %v1506_v8  ;;  %v342_v11 = vpop.f32.mrb[1].mxu1 }
 0x21c   :  { %v343_v27 = vadd.f32 %v1506_v8, %v342_v11 }
 0x21e   :  { %v1702_v13 = vpop.f32.mrb[2].mxu1 }
 0x21f   :  { %v2406_v14 = vadd.f32 %v1702_v13, %v1506_v8  ;;  %v352_v15 = vpop.f32.mrb[3].mxu1 }
 0x220   :  { %v2408_v16 = vadd.f32 %v1506_v8, %v352_v15 }
 0x222   :  { %v1705_v18 = vpop.f32.mrb[4].mxu1 }
 0x223   :  { %v2410_v19 = vadd.f32 %v1705_v18, %v1506_v8  ;;  %v362_v20 = vpop.f32.mrb[5].mxu1 }
 0x224   :  { %v2412_v21 = vadd.f32 %v1506_v8, %v362_v20 }
 0x226   :  { %v1708_v22 = vpop.f32.mrb[6].mxu1 }
 0x227   :  { %v2414_v23 = vadd.f32 %v1708_v22, %v1506_v8  ;;  %v372_v24 = vpop.f32.mrb[7].mxu1 }
 0x228   :  { %v2420_v26 = vadd.f32 %v1506_v8, %v372_v24 }
 0x22a   :  { %v462_v30 = vpop.f32.mrb[8].mxu1 }
 0x22b   :  { %v466_v31 = vadd.f32 %v462_v30, %v343_v27  ;;  %v1719_v32 = vpop.f32.mrb[9].mxu1 }
 0x22d   :  { %v467_v33 = vmul.f32 %v466_v31, %v2424_v29 }
 0x22f   :  { %1971 = vtanh.f32 %v467_v33 }
 0x239   :  { %v1972_v34 = vpop.eup %1971 }
 0x23a   :  { %v469_v35 = vmul.f32 0.5, %v1972_v34 }
 0x23c   :  { %v470_v36 = vadd.f32 0.5, %v469_v35 }
 0x23e   :  { %v471_v37 = vsel %vm2416_vm4, %v1972_v34, %v470_v36 }
 0x23f   :  { %478 = vrot.lane.b32.xlu0 %v471_v37, %s2155_s7 }
 0x243   :  { %473 = vrot.lane.b32.xlu0 %v392_v38, %s2156_s16 }
 0x2b1   :  { %v479_v39 = vpop.permute.xlu0 %478 }
 0x2b2   :  { %v481_v42 = vmul.f32 %v479_v39, %v471_v37 }
 0x2b4   :  { %483 = vrot.lane.b32.xlu1 %v481_v42, %s2156_s16 }
 0x2b5   :  { %v474_v43 = vpop.permute.xlu0 %473 }
 0x2b6   :  { %v476_v46 = vmul.f32 %v474_v43, %v471_v37 }
 0x326   :  { %v484_v47 = vpop.permute.xlu1 %483 }
 0x327   :  { %v486_v48 = vadd.f32 %v484_v47, %v476_v46 }
 0x329   :  { %1973 = vtanh.f32 %v486_v48 }
 0x333   :  { %v1974_v49 = vpop.eup %1973 }
 0x334   :  { %489 = vrot.lane.b32.xlu1 %v1974_v49, %s2155_s7 }
 0x3a6   :  { %v490_v50 = vpop.permute.xlu1 %489 }
 0x3a7   :  { %v492_v51 = vmul.f32 %v490_v50, %v471_v37 }
 0x3a9   :  { %494 = vrot.lane.b32.xlu0 %v492_v51, %s2156_s16 }
 0x41b   :  { %v2434_v52 = vpop.permute.xlu0 %494 }
 0x41c   :  { %1729 = vmatmul.mubr.msk.f32.vlgmr.msra.gmra.mrb[10].mxu1 %vm251_vm1, %v2434_v52 }
 0x41d   :  { %1899 = vmatpush3.bf16.msra.mxu1 %v2368_v41  ;;  %1739 = vmatprep.mubr.msk.f32.mxu1 %vm2152_vm0, %v2153_v45 }
 0x41e   :  { %1900 = vmatprep.subr.bf16.mxu1 %v2151_v40 }
 0x421   :  { %1902 = vmatpush3.bf16.msra.mxu1 %v2373_v44 }
 0x422   :  { %1903 = vmatprep.subr.bf16.mxu1 %v2151_v40 }
 0x4ef   :  { %v564_v53 = vpop.f32.mrb[10].mxu1 }
 0x4f0   :  { %v568_v54 = vadd.f32 %v564_v53, %v348_v10  ;;  %v1730_v55 = vpop.f32.mrb[11].mxu1 }
 0x4f2   :  { %v569_v56 = vmul.f32 %v568_v54, %v2424_v29 }
 0x4f4   :  { %1975 = vtanh.f32 %v569_v56 }
 0x4fe   :  { %v1976_v57 = vpop.eup %1975 }
 0x4ff   :  { %v571_v58 = vmul.f32 0.5, %v1976_v57 }
 0x501   :  { %v572_v59 = vadd.f32 0.5, %v571_v58 }
 0x503   :  { %v573_v60 = vsel %vm2416_vm4, %v1976_v57, %v572_v59 }
 0x504   :  { %576 = vrot.lane.b32.xlu1 %v573_v60, %s2155_s7  ;;  %v574_v63 = vmul.f32 %v573_v60, %v486_v48 }
 0x576   :  { %v577_v61 = vpop.permute.xlu1 %576 }
 0x577   :  { %v579_v62 = vmul.f32 %v577_v61, %v573_v60 }
 0x579   :  { %581 = vrot.lane.b32.xlu0 %v579_v62, %s2156_s16 }
 0x5eb   :  { %v582_v0 = vpop.permute.xlu0 %581 }
 0x5ec   :  { %v584_v1 = vadd.f32 %v582_v0, %v574_v63 }
 0x5ee   :  { %1977 = vtanh.f32 %v584_v1 }
 0x5f8   :  { %v1978_v2 = vpop.eup %1977 }
 0x5f9   :  { %587 = vrot.lane.b32.xlu1 %v1978_v2, %s2155_s7 }
 0x66b   :  { %v588_v3 = vpop.permute.xlu1 %587 }
 0x66c   :  { %v590_v4 = vmul.f32 %v588_v3, %v573_v60 }
 0x66e   :  { %592 = vrot.lane.b32.xlu0 %v590_v4, %s2156_s16 }
 0x6e0   :  { %v2451_v5 = vpop.permute.xlu0 %592 }
 0x6e1   :  { %1740 = vmatmul.mubr.msk.f32.vlgmr.msra.gmra.mrb[12].mxu1 %vm251_vm1, %v2451_v5 }
 0x6e2   :  { %1905 = vmatpush3.bf16.msra.mxu1 %v2368_v41  ;;  %1750 = vmatprep.mubr.msk.f32.mxu1 %vm2152_vm0, %v2153_v45 }
 0x6e3   :  { %1906 = vmatprep.subr.bf16.mxu1 %v2151_v40 }
 0x6e6   :  { %1908 = vmatpush3.bf16.msra.mxu1 %v2373_v44 }
 0x6e7   :  { %1909 = vmatprep.subr.bf16.mxu1 %v2151_v40 }
 0x7b4   :  { %v662_v6 = vpop.f32.mrb[12].mxu1 }
 0x7b5   :  { %v666_v7 = vadd.f32 %v662_v6, %v2408_v16  ;;  %v1741_v8 = vpop.f32.mrb[13].mxu1 }
 0x7b7   :  { %v667_v9 = vmul.f32 %v666_v7, %v2424_v29 }
 0x7b9   :  { %1979 = vtanh.f32 %v667_v9 }
 0x7c3   :  { %v1980_v10 = vpop.eup %1979 }
 0x7c4   :  { %v669_v11 = vmul.f32 0.5, %v1980_v10 }
 0x7c6   :  { %v670_v12 = vadd.f32 0.5, %v669_v11 }
 0x7c8   :  { %v671_v13 = vsel %vm2416_vm4, %v1980_v10, %v670_v12 }
 0x7c9   :  { %674 = vrot.lane.b32.xlu1 %v671_v13, %s2155_s7  ;;  %v672_v18 = vmul.f32 %v671_v13, %v584_v1 }
 0x83b   :  { %v675_v15 = vpop.permute.xlu1 %674 }
 0x83c   :  { %v677_v17 = vmul.f32 %v675_v15, %v671_v13 }
 0x83e   :  { %679 = vrot.lane.b32.xlu0 %v677_v17, %s2156_s16 }
 0x8b0   :  { %v680_v20 = vpop.permute.xlu0 %679 }
 0x8b1   :  { %v682_v22 = vadd.f32 %v680_v20, %v672_v18 }
 0x8b3   :  { %1981 = vtanh.f32 %v682_v22 }
 0x8bd   :  { %v1982_v16 = vpop.eup %1981 }
 0x8be   :  { %685 = vrot.lane.b32.xlu1 %v1982_v16, %s2155_s7  ;;  %v1194_v16 = vld [vmem:[#allocation8 + $0x18] sm:$0xff] }
 0x930   :  { %v686_v24 = vpop.permute.xlu1 %685 }
 0x931   :  { %v688_v27 = vmul.f32 %v686_v24, %v671_v13  ;;  %v1192_v13 = vld [vmem:[#allocation8 + $0x8] sm:$0xff] }
 0x933   :  { %690 = vrot.lane.b32.xlu0 %v688_v27, %s2156_s16 }
 0x9a5   :  { %v2469_v28 = vpop.permute.xlu0 %690 }
 0x9a6   :  { %1751 = vmatmul.mubr.msk.f32.vlgmr.msra.gmra.mrb[14].mxu1 %vm251_vm1, %v2469_v28 }
 0x9a7   :  { %1911 = vmatpush3.bf16.msra.mxu1 %v2368_v41  ;;  %1761 = vmatprep.mubr.msk.f32.mxu1 %vm2152_vm0, %v2153_v45 }
 0x9a8   :  { %1912 = vmatprep.subr.bf16.mxu1 %v2151_v40 }
 0x9ab   :  { %1914 = vmatpush3.bf16.msra.mxu1 %v2373_v44 }
 0x9ac   :  { %1921 = vmatprep.subr.bf16.mxu1 %v2151_v40 }
 0xa79   :  { %v760_v30 = vpop.f32.mrb[14].mxu1 }
 0xa7a   :  { %v764_v31 = vadd.f32 %v760_v30, %v2406_v14  ;;  %v1752_v32 = vpop.f32.mrb[15].mxu1 }
 0xa7c   :  { %v765_v33 = vmul.f32 %v764_v31, %v2424_v29 }
 0xa7e   :  { %1983 = vtanh.f32 %v765_v33 }
 0xa88   :  { %v1984_v34 = vpop.eup %1983 }
 0xa89   :  { %v767_v35 = vmul.f32 0.5, %v1984_v34 }
 0xa8b   :  { %v768_v36 = vadd.f32 0.5, %v767_v35 }
 0xa8d   :  { %v769_v37 = vsel %vm2416_vm4, %v1984_v34, %v768_v36 }
 0xa8e   :  { %772 = vrot.lane.b32.xlu1 %v769_v37, %s2155_s7  ;;  %v770_v42 = vmul.f32 %v769_v37, %v682_v22  ;;  %v1193_v22 = vld [vmem:[#allocation8 + $0x10] sm:$0xff] }
 0xa8f   :  { %v1937_v24 = vpack.c.bf16 %v1194_v16, %v1193_v22 }
 0xb00   :  { %v773_v38 = vpop.permute.xlu1 %772 }
 0xb01   :  { %v775_v39 = vmul.f32 %v773_v38, %v769_v37 }
 0xb03   :  { %777 = vrot.lane.b32.xlu0 %v775_v39, %s2156_s16 }
 0xb75   :  { %v778_v43 = vpop.permute.xlu0 %777 }
 0xb76   :  { %v780_v46 = vadd.f32 %v778_v43, %v770_v42 }
 0xb78   :  { %1985 = vtanh.f32 %v780_v46 }
 0xb82   :  { %v1986_v14 = vpop.eup %1985 }
 0xb83   :  { %783 = vrot.lane.b32.xlu1 %v1986_v14, %s2155_s7 }
 0xbf5   :  { %v784_v47 = vpop.permute.xlu1 %783 }
 0xbf6   :  { %v786_v48 = vmul.f32 %v784_v47, %v769_v37 }
 0xbf8   :  { %788 = vrot.lane.b32.xlu0 %v786_v48, %s2156_s16  ;;  %v1317_v48 = vld [vmem:[%s2654_s10] sm:$0xff] }
 0xc6a   :  { %v2487_v49 = vpop.permute.xlu0 %788 }
 0xc6b   :  { %1762 = vmatmul.mubr.msk.f32.vlgmr.msra.gmra.mrb[16].mxu1 %vm251_vm1, %v2487_v49 }
 0xc6c   :  { %1923 = vmatpush3.bf16.msra.mxu1 %v2368_v41  ;;  %1783 = vmatprep.mubr.msk.f32.mxu1 %vm2152_vm0, %v2153_v45 }
 0xc6d   :  { %1924 = vmatprep.subr.bf16.mxu1 %v2151_v40 }
 0xc70   :  { %1926 = vmatpush3.bf16.msra.mxu1 %v2373_v44 }
 0xd3e   :  { %v858_v50 = vpop.f32.mrb[16].mxu1 }
 0xd3f   :  { %v862_v51 = vadd.f32 %v858_v50, %v2412_v21  ;;  %v1763_v53 = vpop.f32.mrb[17].mxu1 }
 0xd41   :  { %v863_v54 = vmul.f32 %v862_v51, %v2424_v29 }
 0xd43   :  { %1987 = vtanh.f32 %v863_v54 }
 0xd4d   :  { %v1988_v55 = vpop.eup %1987 }
 0xd4e   :  { %v865_v56 = vmul.f32 0.5, %v1988_v55 }
 0xd50   :  { %v866_v57 = vadd.f32 0.5, %v865_v56 }
 0xd52   :  { %v867_v58 = vsel %vm2416_vm4, %v1988_v55, %v866_v57  ;;  %v2549_v55 = vld [vmem:[%s2653_s9] ss:$0 sm:$0xff]  ;;  %v1319_v57 = vld [vmem:[%s2654_s10 + $0x10] sm:$0xff] }
 0xd53   :  { %870 = vrot.lane.b32.xlu1 %v867_v58, %s2155_s7  ;;  %v868_v61 = vmul.f32 %v867_v58, %v780_v46 }
 0xdc5   :  { %v871_v59 = vpop.permute.xlu1 %870 }
 0xdc6   :  { %v873_v60 = vmul.f32 %v871_v59, %v867_v58 }
 0xdc8   :  { %875 = vrot.lane.b32.xlu0 %v873_v60, %s2156_s16 }
 0xe3a   :  { %v876_v62 = vpop.permute.xlu0 %875 }
 0xe3b   :  { %v878_v63 = vadd.f32 %v876_v62, %v868_v61  ;;  %v1321_v62 = vld [vmem:[%s2654_s10 + $0x20] sm:$0xff] }
 0xe3d   :  { %1989 = vtanh.f32 %v878_v63 }
 0xe47   :  { %v1990_v21 = vpop.eup %1989 }
 0xe48   :  { %881 = vrot.lane.b32.xlu1 %v1990_v21, %s2155_s7 }
 0xeba   :  { %v882_v0 = vpop.permute.xlu1 %881 }
 0xebb   :  { %v884_v1 = vmul.f32 %v882_v0, %v867_v58  ;;  %v1320_v58 = vld [vmem:[%s2654_s10 + $0x18] sm:$0xff]  ;;  %v1323_v0 = vld [vmem:[%s2654_s10 + $0x30] sm:$0xff] }
 0xebc   :  { %v1945_v59 = vpack.c.bf16 %v1320_v58, %v1319_v57 }
 0xebd   :  { %886 = vrot.lane.b32.xlu0 %v884_v1, %s2156_s16  ;;  %v1324_v1 = vld [vmem:[%s2654_s10 + $0x38] sm:$0xff] }
 0xf2f   :  { %v887_v2 = vpop.permute.xlu0 %886 }
 0xf30   :  { %1773 = vmatmul.mubr.msk.f32.vlgmr.msra.gmra.mrb[8].mxu0 %vm251_vm1, %v887_v2 }
 0xf31   :  { %1929 = vmatpush3.bf16.msra.mxu0 %v2368_v41  ;;  %1794 = vmatprep.mubr.msk.f32.mxu0 %vm2152_vm0, %v2153_v45 }
 0xf32   :  { %1930 = vmatprep.subr.bf16.mxu0 %v2151_v40 }
 0xf35   :  { %1932 = vmatpush3.bf16.msra.mxu0 %v2373_v44 }
0x1003   :  { %v956_v3 = vpop.f32.mrb[8].mxu0 }
0x1004   :  { %v960_v4 = vadd.f32 %v956_v3, %v2410_v19  ;;  %v1774_v6 = vpop.f32.mrb[9].mxu0  ;;  %v1191_v19 = vld [vmem:[#allocation8] sm:$0xff] }
0x1005   :  { %v1933_v15 = vpack.c.bf16 %v1192_v13, %v1191_v19  ;;  %v2588_v13 = vld [vmem:[%s2655_s11] ss:$0 sm:$0xff]  ;;  %s2157_s11 = smov [#allocation11]  }
0x1006   :  { %v961_v7 = vmul.f32 %v960_v4, %v2424_v29  ;;  %s1487_s0 = sshll.u32 %s2157_s11, 4  ;;  %s1488_s0 = int_to_ptr.vmem [resolvable:$true] %s1487_s0 }
0x1007   :  { %1934 = vmatprep.subr.bf16.mxu1 %v1933_v15  ;;  %s2091_s5 = scalar_lea.vmem %s1488_s0, 256  ;;  %p2096_p5 = scmp.lt.s32.totalorder %s1488_s0, %s1488_s0 }
0x1008   :  { %1991 = vtanh.f32 %v961_v7  ;;  %p2092_p4 = scmp.ne.s32.totalorder %s1488_s0, %s2091_s5  ;;  %p2097_p6 = scmp.lt.s32.totalorder %s2091_s5, %s2091_s5 }
0x100a   :  { %p2098_p7 = por %p2097_p6, %p2096_p5 }
0x100c   :  { %p2099_p8 = pnand %p2098_p7, %p2092_p4 }
0x1012   :  { %v1992_v8 = vpop.eup %1991 }
0x1013   :  { %v963_v9 = vmul.f32 0.5, %v1992_v8 }
0x1015   :  { %v964_v10 = vadd.f32 0.5, %v963_v9 }
0x1017   :  { %v965_v41 = vsel %vm2416_vm4, %v1992_v8, %v964_v10 }
0x1018   :  { %968 = vrot.lane.b32.xlu1 %v965_v41, %s2155_s7  ;;  %v966_v40 = vmul.f32 %v965_v41, %v878_v63  ;;  %v1322_v63 = vld [vmem:[%s2654_s10 + $0x28] sm:$0xff] }
0x1019   :  { %v1949_v21 = vpack.c.bf16 %v1322_v63, %v1321_v62 }
0x108a   :  { %v969_v45 = vpop.permute.xlu1 %968 }
0x108b   :  { %v971_v11 = vmul.f32 %v969_v45, %v965_v41 }
0x108d   :  { %973 = vrot.lane.b32.xlu0 %v971_v11, %s2156_s16 }
0x10ff   :  { %v974_v44 = vpop.permute.xlu0 %973 }
0x1100   :  { %v976_v12 = vadd.f32 %v974_v44, %v966_v40 }
0x1102   :  { %1993 = vtanh.f32 %v976_v12 }
0x110c   :  { %v1994_v17 = vpop.eup %1993 }
0x110d   :  { %979 = vrot.lane.b32.xlu1 %v1994_v17, %s2155_s7 }
0x117f   :  { %v980_v18 = vpop.permute.xlu1 %979 }
0x1180   :  { %v982_v20 = vmul.f32 %v980_v18, %v965_v41 }
0x1182   :  { %984 = vrot.lane.b32.xlu0 %v982_v20, %s2156_s16 }
0x11f4   :  { %v985_v27 = vpop.permute.xlu0 %984 }
0x11f5   :  { %1784 = vmatmul.mubr.msk.f32.vlgmr.msra.gmra.mrb[18].mxu1 %vm251_vm1, %v985_v27 }
0x11f6   :  { %1936 = vmatpush3.bf16.msra.mxu1 %v1933_v15  ;;  %1805 = vmatprep.mubr.msk.f32.mxu1 %vm251_vm1, %v2434_v52 }
0x11f7   :  { %1938 = vmatprep.subr.bf16.mxu1 %v1937_v24 }
0x11fa   :  { %1940 = vmatpush3.bf16.msra.mxu1 %v1937_v24 }
0x11fd   :  { %1806 = vmatmul.mubr.msk.f32.vlgmr.msra.gmra.mrb[20].mxu1 %vm251_vm1, %v2451_v5 }
0x11fe   :  { %1808 = vmatprep.mubr.msk.f32.mxu1 %vm251_vm1, %v2469_v28 }
0x1201   :  { %1809 = vmatmul.mubr.msk.f32.gmra.mrb[22].mxu1 %vm251_vm1, %v2487_v49  ;;  %v1318_v49 = vld [vmem:[%s2654_s10 + $0x8] sm:$0xff] }
0x1202   :  { %1811 = vmatprep.mubr.msk.f32.mxu1 %vm251_vm1, %v887_v2  ;;  %v1941_v50 = vpack.c.bf16 %v1318_v49, %v1317_v48  ;;  %v1953_v2 = vpack.c.bf16 %v1324_v1, %v1323_v0 }
0x1204   :  { %1942 = vmatprep.subr.bf16.mxu0 %v1941_v50 }
0x1205   :  { %1812 = vmatmul.mubr.msk.f32.gmra.mrb[24].mxu1 %vm251_vm1, %v985_v27 }
0x12c8   :  { %v1054_v30 = vpop.f32.mrb[18].mxu1 }
0x12c9   :  { %v1058_v31 = vadd.f32 %v1054_v30, %v2420_v26  ;;  %v1785_v32 = vpop.f32.mrb[19].mxu1 }
0x12cb   :  { %v1059_v52 = vmul.f32 %v1058_v31, %v2424_v29 }
0x12cd   :  { %1995 = vtanh.f32 %v1059_v52 }
0x12d0   :  { %v1807_v33 = vpop.f32.mrb[20].mxu1 }
0x12d1   :  { %v1270_v34 = vpop.f32.mrb[21].mxu1  ;;  %v1276_v3 = vadd.f32 %v1807_v33, %v2549_v55 }
0x12d2   :  { %v1271_v56 = vadd.f32 %v2549_v55, %v1270_v34 }
0x12d3   :  { %v1310_v6 = vmax.f32 %v1276_v3, 0.0 }
0x12d4   :  { %v1810_v5 = vpop.f32.mrb[22].mxu1  ;;  %v1309_v60 = vmax.f32 %v1271_v56, 0.0 }
0x12d5   :  { %v1280_v35 = vpop.f32.mrb[23].mxu1  ;;  %v1286_v7 = vadd.f32 %v1810_v5, %v2549_v55 }
0x12d6   :  { %v1281_v4 = vadd.f32 %v2549_v55, %v1280_v35 }
0x12d7   :  { %v1996_v36 = vpop.eup %1995  ;;  %v1312_v10 = vmax.f32 %v1286_v7, 0.0 }
0x12d8   :  { %v1813_v28 = vpop.f32.mrb[24].mxu1  ;;  %v1061_v37 = vmul.f32 0.5, %v1996_v36  ;;  %v1311_v8 = vmax.f32 %v1281_v4, 0.0 }
0x12d9   :  { %v1290_v38 = vpop.f32.mrb[25].mxu1  ;;  %v1296_v41 = vadd.f32 %v1813_v28, %v2549_v55 }
0x12da   :  { %v1062_v39 = vadd.f32 0.5, %v1061_v37  ;;  %v1291_v9 = vadd.f32 %v2549_v55, %v1290_v38 }
0x12db   :  { %v1314_v11 = vmax.f32 %v1296_v41, 0.0 }
0x12dc   :  { %v1063_v42 = vsel %vm2416_vm4, %v1996_v36, %v1062_v39  ;;  %v1313_v45 = vmax.f32 %v1291_v9, 0.0 }
0x12dd   :  { %1066 = vrot.lane.b32.xlu1 %v1063_v42, %s2155_s7  ;;  %v1064_v46 = vmul.f32 %v1063_v42, %v976_v12 }
0x134f   :  { %v1067_v43 = vpop.permute.xlu1 %1066 }
0x1350   :  { %v1069_v26 = vmul.f32 %v1067_v43, %v1063_v42 }
0x1352   :  { %1071 = vrot.lane.b32.xlu0 %v1069_v26, %s2156_s16 }
0x13c4   :  { %v1072_v14 = vpop.permute.xlu0 %1071 }
0x13c5   :  { %v2535_v47 = vadd.f32 %v1072_v14, %v1064_v46 }
0x13c7   :  { %1997 = vtanh.f32 %v2535_v47 }
0x13d1   :  { %v1998_v51 = vpop.eup %1997 }
0x13d2   :  { %1077 = vrot.lane.b32.xlu1 %v1998_v51, %s2155_s7 }
0x1444   :  { %v1078_v53 = vpop.permute.xlu1 %1077 }
0x1445   :  { %v1080_v54 = vmul.f32 %v1078_v53, %v1063_v42 }
0x1447   :  { %1082 = vrot.lane.b32.xlu0 %v1080_v54, %s2156_s16 }
0x14b9   :  { %v1083_v61 = vpop.permute.xlu0 %1082 }
0x14ba   :  { %1795 = vmatmul.mubr.msk.f32.vlgmr.msra.gmra.mrb[10].mxu0 %vm251_vm1, %v1083_v61  ;;  %1814 = vmatprep.mubr.msk.f32.mxu1 %vm251_vm1, %v1083_v61 }
0x14bb   :  { %1944 = vmatpush3.bf16.msra.mxu0 %v1941_v50  ;;  %1833 = vmatprep.mubr.msk.f32.mxu0 %vm1332_vm5, %v1309_v60 }
0x14bc   :  { %1946 = vmatprep.subr.bf16.mxu0 %v1945_v59 }
0x14bf   :  { %1948 = vmatpush3.bf16.msra.mxu0 %v1945_v59 }
0x14c0   :  { %1950 = vmatprep.subr.bf16.mxu0 %v1949_v21 }
0x14c3   :  { %1952 = vmatpush3.bf16.msra.mxu0 %v1949_v21 }
0x14c4   :  { %1954 = vmatprep.subr.bf16.mxu0 %v1953_v2 }
0x14c7   :  { %1956 = vmatpush3.bf16.msra.mxu0 %v1953_v2 }
0x14ca   :  { %1834 = vmatmul.mubr.msk.f32.vlgmr.msra.gmra.mrb[12].mxu0 %vm1332_vm5, %v1310_v6 }
0x14cb   :  { %1836 = vmatprep.mubr.msk.f32.mxu0 %vm1332_vm5, %v1311_v8 }
0x14ce   :  { %1837 = vmatmul.mubr.msk.f32.gmra.mrb[14].mxu0 %vm1332_vm5, %v1312_v10 }
0x14cf   :  { %1839 = vmatprep.mubr.msk.f32.mxu0 %vm1332_vm5, %v1313_v45 }
0x14d2   :  { %1840 = vmatmul.mubr.msk.f32.gmra.mrb[16].mxu0 %vm1332_vm5, %v1314_v11 }
0x158d   :  { %v1152_v40 = vpop.f32.mrb[10].mxu0 }
0x158e   :  { %v1156_v44 = vadd.f32 %v1152_v40, %v2414_v23  ;;  %v1796_v12 = vpop.f32.mrb[11].mxu0 }
0x1590   :  { %v1157_v19 = vmul.f32 %v1156_v44, %v2424_v29 }
0x1592   :  { %1999 = vtanh.f32 %v1157_v19 }
0x159c   :  { %v2000_v15 = vpop.eup %1999 }
0x159d   :  { %v1835_v17 = vpop.f32.mrb[12].mxu0  ;;  %v1159_v18 = vmul.f32 0.5, %v2000_v15 }
0x159e   :  { %v1429_v20 = vadd.f32 %v1835_v17, %v2588_v13  ;;  %v1423_v22 = vpop.f32.mrb[13].mxu0 }
0x159f   :  { %v1424_v16 = vadd.f32 %v2588_v13, %v1423_v22  ;;  %v1160_v24 = vadd.f32 0.5, %v1159_v18 }
0x15a0   :  { %1463 = vst [vmem:[#allocation10 + $0x8] sm:$0xff] %v1429_v20 }
0x15a1   :  { %1462 = vst [vmem:[#allocation10] sm:$0xff] %v1424_v16  ;;  %v1838_v23 = vpop.f32.mrb[14].mxu0  ;;  %v1161_v29 = vsel %vm2416_vm4, %v2000_v15, %v1160_v24 }
0x15a2   :  { %v1439_v27 = vadd.f32 %v1838_v23, %v2588_v13  ;;  %v1433_v30 = vpop.f32.mrb[15].mxu0  ;;  %1164 = vrot.lane.b32.xlu1 %v1161_v29, %s2155_s7  ;;  %v1162_v35 = vmul.f32 %v1161_v29, %v2535_v47 }
0x15a3   :  { %v1434_v31 = vadd.f32 %v2588_v13, %v1433_v30 }
0x15a4   :  { %1465 = vst [vmem:[#allocation10 + $0x18] sm:$0xff] %v1439_v27 }
0x15a5   :  { %1464 = vst [vmem:[#allocation10 + $0x10] sm:$0xff] %v1434_v31  ;;  %v1841_v32 = vpop.f32.mrb[16].mxu0 }
0x15a6   :  { %v1449_v52 = vadd.f32 %v1841_v32, %v2588_v13  ;;  %v1443_v33 = vpop.f32.mrb[17].mxu0 }
0x15a7   :  { %v1444_v34 = vadd.f32 %v2588_v13, %v1443_v33 }
0x15a8   :  { %1467 = vst [vmem:[#allocation10 + $0x28] sm:$0xff] %v1449_v52 }
0x15a9   :  { %1466 = vst [vmem:[#allocation10 + $0x20] sm:$0xff] %v1444_v34 }
0x1614   :  { %v1165_v5 = vpop.permute.xlu1 %1164 }
0x1615   :  { %v1167_v25 = vmul.f32 %v1165_v5, %v1161_v29 }
0x1617   :  { %1169 = vrot.lane.b32.xlu0 %v1167_v25, %s2156_s16 }
0x1689   :  { %v1170_v36 = vpop.permute.xlu0 %1169 }
0x168a   :  { %v1172_v28 = vadd.f32 %v1170_v36, %v1162_v35 }
0x168c   :  { %2001 = vtanh.f32 %v1172_v28 }
0x1696   :  { %v2002_v37 = vpop.eup %2001 }
0x1697   :  { %1175 = vrot.lane.b32.xlu1 %v2002_v37, %s2155_s7 }
0x169b   :  { %1180 = vrot.lane.b32.xlu1 %v1172_v28, %s2155_s7 }
0x1709   :  { %v1176_v38 = vpop.permute.xlu1 %1175 }
0x170a   :  { %v1178_v39 = vmul.f32 %v1176_v38, %v1161_v29 }
0x170c   :  { %1183 = vrot.lane.b32.xlu0 %v1178_v39, %s2156_s16 }
0x170d   :  { %v1181_v42 = vpop.permute.xlu1 %1180 }
0x1710   :  { %1185 = vrot.lane.b32.xlu0 %v1181_v42, %s2156_s16 }
0x177e   :  { %v1184_v43 = vpop.permute.xlu0 %1183 }
0x177f   :  { %1189 = vst.msk [vmem:[#allocation11] sm:$0xff] %vm251_vm1, %v1184_v43  ;;  %1815 = vmatmul.mubr.msk.f32.gmra.mrb[26].mxu1 %vm251_vm1, %v1184_v43 }
0x1782   :  { %v1186_v26 = vpop.permute.xlu0 %1185 }
0x1783   :  { %1190 = vst.msk [vmem:[#allocation11 + $0x8] sm:$0xff] %vm251_vm1, %v1186_v26 }
0x1852   :  { %v1816_v46 = vpop.f32.mrb[26].mxu1 }
0x1853   :  { %v1306_v14 = vadd.f32 %v1816_v46, %v2549_v55  ;;  %v1300_v47 = vpop.f32.mrb[27].mxu1 }
0x1854   :  { %v1301_v48 = vadd.f32 %v2549_v55, %v1300_v47 }
0x1855   :  { %v1316_v50 = vmax.f32 %v1306_v14, 0.0 }
0x1856   :  { %v1315_v49 = vmax.f32 %v1301_v48, 0.0 }
0x1858   :  { %1842 = vmatprep.mubr.msk.f32.mxu0 %vm1332_vm5, %v1315_v49 }
0x1859   :  { %1843 = vmatmul.mubr.msk.f32.gmra.mrb[18].mxu0 %vm1332_vm5, %v1316_v50 }
0x185a   :  { %2102 = shalt.err (!%p2099_p8)
}
0x185b   :  { %s2103_s7 = scalar_lea.hbm %s2657_s13, 256 }
0x185c   :  { %p2104_p9 = scmp.ne.s32.totalorder %s2657_s13, %s2103_s7  ;;  %p2107_p10 = scmp.lt.u32.totalorder %s2103_s7, %s2657_s13 }
0x185e   :  { %p2109_p11 = pnand %p2107_p10, %p2104_p9 }
0x1860   :  { %2112 = shalt.err (!%p2109_p11)
}
0x1861   :  { %1493 = dma.vmem_to_hbm [thread:$0]  %s1488_s0, 256, %s2657_s13, [#allocation12], %s2148_s1, %s2148_s1, %s2149_s28  }
0x1862   :  { %s2158_s27 = smov [#allocation10]  }
0x1863   :  { %s1475_s3 = sshll.u32 %s2158_s27, 4  ;;  %s1476_s3 = int_to_ptr.vmem [resolvable:$true] %s1475_s3 }
0x1864   :  { %s2113_s8 = scalar_lea.vmem %s1476_s3, 1024  ;;  %p2118_p13 = scmp.lt.s32.totalorder %s1476_s3, %s1476_s3 }
0x1865   :  { %p2114_p12 = scmp.ne.s32.totalorder %s1476_s3, %s2113_s8  ;;  %p2119_p0 = scmp.lt.s32.totalorder %s2113_s8, %s2113_s8 }
0x1867   :  { %p2120_p1 = por %p2119_p0, %p2118_p13 }
0x1869   :  { %p2121_p2 = pnand %p2120_p1, %p2114_p12 }
0x192c   :  { %v1844_v51 = vpop.f32.mrb[18].mxu0 }
0x192d   :  { %v1459_v53 = vadd.f32 %v1844_v51, %v2588_v13  ;;  %v1453_v54 = vpop.f32.mrb[19].mxu0 }
0x192e   :  { %v1454_v55 = vadd.f32 %v2588_v13, %v1453_v54 }
0x192f   :  { %1469 = vst [vmem:[#allocation10 + $0x38] sm:$0xff] %v1459_v53 }
0x1930   :  { %1468 = vst [vmem:[#allocation10 + $0x30] sm:$0xff] %v1454_v55 }
0x1931   :  { %2124 = shalt.err (!%p2121_p2)
}
0x1932   :  { %s2125_s30 = scalar_lea.hbm %s2656_s12, 1024 }
0x1933   :  { %p2126_p3 = scmp.ne.s32.totalorder %s2656_s12, %s2125_s30  ;;  %p2129_p4 = scmp.lt.u32.totalorder %s2125_s30, %s2656_s12 }
0x1935   :  { %p2131_p5 = pnand %p2129_p4, %p2126_p3 }
0x1937   :  { %2134 = shalt.err (!%p2131_p5)
}
0x1938   :  { %1481 = dma.vmem_to_hbm [thread:$0]  %s1476_s3, 1024, %s2656_s12, [#allocation4], %s2148_s1, %s2148_s1, %s2149_s28  }
0x1939   :  { %2141 = dma.done.wait [#allocation4], 1024  }
0x193a   :  { %2142 = vsyncadd [#allocation4], 4294966272 }
0x193b   :  { %2143 = dma.done.wait [#allocation12], 256  }
0x193c   :  { %2144 = vsyncadd [#allocation12], 4294967040 }
0x193d   :  { %1500 = vsyncpa [#allocation3], 1 }
0x193e   :  { %1501 = vsyncpa [#allocation6], 1 }
0x193f   :  { %1502 = vsyncpa [#allocation9], 1 }
0x1940   :  { %1503 = vsyncpa [#allocation4], 1 }
0x1941   :  { %1504 = vsyncpa [#allocation12], 1 }

</bundles_post_ra>
